<compile_context>
chip_gen: v6e
topology: v6e:2x2x1
jax: 0.10.0
libtpu: 0.0.40
codegen_flags: <defaults>
</compile_context>

<pallas_src>
import functools

import jax
import jax.numpy as jnp
from jax.experimental import pallas as pl
from jax.experimental.pallas import tpu as pltpu

EPS = 1e-5  # torch.nn.LayerNorm default eps


# ----------------------------- kernel helpers -----------------------------
def _layernorm(x, gamma, beta):
    x = x.astype(jnp.float32)                      # LN statistics always in f32
    mean = jnp.mean(x, axis=-1, keepdims=True)
    var = jnp.mean((x - mean) ** 2, axis=-1, keepdims=True)
    return (x - mean) * jax.lax.rsqrt(var + EPS) * gamma + beta


def _gelu_exact(x):
    # torch.nn.GELU() default is the exact (erf-based) formulation.
    return 0.5 * x * (1.0 + jax.lax.erf(x * jnp.float32(0.7071067811865476)))


def _softmax_lastdim(x, approx):
    m = jnp.max(x, axis=-1, keepdims=True)
    e = jnp.exp(x - m)
    # approx reciprocal (EUP path) only on the bf16 route to preserve the
    # strict 1e-4 parity of the f32 path.
    return e * pl.reciprocal(jnp.sum(e, axis=-1, keepdims=True), approx=approx)


# --------------------------------- kernel ---------------------------------
def encoder_kernel(x_ref, gamma_ref, beta_ref, wqkv_ref, bqkv_ref,
                   wo3_ref, bo_ref, w1_ref, b1_ref, w2_ref, b2_ref,
                   out_ref, q_sc, k_sc, v_sc,
                   *, num_head, dim_head, tq, fast_math):
    H = num_head * dim_head
    cdt = wqkv_ref.dtype                  # compute dtype for MXU operands
    qt = pl.program_id(1)
    gamma = gamma_ref[...].astype(jnp.float32)    # [1, H], broadcasts over rows
    beta = beta_ref[...].astype(jnp.float32)

    # ---- once per batch element: LN + fused QKV over the full sequence ----
    @pl.when(qt == 0)
    def _():
        ln1 = _layernorm(x_ref[0], gamma, beta)                       # [S, H] f32
        qkv = jnp.dot(ln1.astype(cdt), wqkv_ref[...],
                      preferred_element_type=jnp.float32) + bqkv_ref[...]
        # 1/sqrt(dim_head) is already folded into the Q weight/bias host-side.
        qs = qkv[:, 0 * H:1 * H].astype(cdt)
        ks = qkv[:, 1 * H:2 * H].astype(cdt)
        vs = qkv[:, 2 * H:3 * H].astype(cdt)
        for h in range(num_head):              # 3*nh static slices, once per batch
            sl = slice(h * dim_head, (h + 1) * dim_head)
            q_sc[h] = qs[:, sl]
            k_sc[h] = ks[:, sl]
            v_sc[h] = vs[:, sl]

    # ---- per query tile: attention (batched over heads) + FFN --------------
    row0 = pl.multiple_of(qt * tq, tq)
    x_t = x_ref[0, pl.ds(row0, tq), :].astype(jnp.float32)            # [tq, H]
    q_h = q_sc[:, pl.ds(row0, tq), :]                                 # [nh, tq, dh]

    # Minor-dim contraction on both operands -> MXU transposed-operand load,
    # no per-tile XLU transpose of K.
    scores = jnp.einsum("hqd,hkd->hqk", q_h, k_sc[...],
                        preferred_element_type=jnp.float32)           # [nh, tq, S]
    probs = _softmax_lastdim(scores, fast_math)                       # f32 stats
    heads = jnp.einsum("hqk,hkd->hqd", probs.astype(cdt), v_sc[...],
                       preferred_element_type=jnp.float32)            # [nh, tq, dh]

    # Fused head-concat + Wo: batched (tq,dh)@(dh,H) per head, then an nh-term
    # add -- no cross-lane concat of dh-wide pieces.
    per_head = jnp.einsum("hqd,hdn->hqn", heads.astype(cdt), wo3_ref[...],
                          preferred_element_type=jnp.float32)         # [nh, tq, H]
    att_out = bo_ref[...].astype(jnp.float32)
    for h in range(num_head):
        att_out = att_out + per_head[h]
    x1 = x_t + att_out

    # ---- sub-layer 2: feed-forward on LayerNorm(x1) (same LN params, as in
    # the PyTorch module which reuses self.lnorms for both sub-layers) --------
    ln2 = _layernorm(x1, gamma, beta)
    h1 = _gelu_exact(jnp.dot(ln2.astype(cdt), w1_ref[...],
                             preferred_element_type=jnp.float32) + b1_ref[...])
    ffn = jnp.dot(h1.astype(cdt), w2_ref[...],
                  preferred_element_type=jnp.float32) + b2_ref[...]
    # TODO(synk): Dropout is identity at inference (eval mode); not modeled.
    out_ref[0] = (x1 + ffn).astype(out_ref.dtype)


# -------------------------------- wrapper ----------------------------------
def _choose_q_tile(S, H, num_head, cdt_itemsize, vmem_budget, row_align):
    """Largest row-aligned divisor of S whose per-tile footprint fits VMEM."""
    if S <= row_align:
        return S
    # Persistent per-batch VMEM: single-buffered x (f32) + head-major Q/K/V.
    persistent = S * H * 4 + 3 * S * H * cdt_itemsize
    avail = max(vmem_budget // 2 - persistent, 0)     # headroom: weights, compiler
    # Dominant per-tile transients: f32 scores+probs (2*nh*tq*S*4B) plus the
    # per-head Wo partials and FFN activations (~(nh+8)*tq*H*4B).
    per_row = 4 * (2 * num_head * S + num_head * H + 8 * H)
    cap = min(max(avail // max(per_row, 1), row_align), 512, S)
    best = 0
    t = row_align
    while t <= cap:
        if S % t == 0:
            best = t
        t += row_align
    return best if best else S


def encoder_layers(x, params, num_head, *, compute_dtype=None, q_tile=None):
    B, S, H = x.shape
    assert H % num_head == 0
    dim_head = H // num_head
    cdt = jnp.dtype(x.dtype if compute_dtype is None else compute_dtype)
    fast_math = cdt != jnp.dtype(jnp.float32)
    row_align = 16 if cdt.itemsize < 4 else 8          # bf16 packs 2 rows/sublane

    # Generation-aware VMEM budget: ~56 MiB on v7x (64 MiB/TC), 112 MiB on
    # v5e/v6e (128 MiB).  Never hard-code the physical maximum.
    try:
        vmem_cap = int(pltpu.get_tpu_info().vmem_capacity_bytes)
    except Exception:
        vmem_cap = 64 * 1024 * 1024
    vmem_limit = min(vmem_cap * 7 // 8, 112 * 1024 * 1024)

    tq = (_choose_q_tile(S, H, num_head, cdt.itemsize, vmem_limit, row_align)
          if q_tile is None else q_tile)
    assert S % tq == 0
    nq = S // tq

    # Fused QKV packing with 1/sqrt(dh) folded into the Q weight & bias;
    # weights in compute dtype, biases / LN params stay f32 (added after f32
    # accumulation).  Wo is pre-reshaped head-major for the fused output proj.
    inv_sqrt_dk = 1.0 / float(dim_head) ** 0.5
    wqkv = jnp.concatenate(
        [params["wq"] * inv_sqrt_dk, params["wk"], params["wv"]],
        axis=1).astype(cdt)
    bqkv = jnp.concatenate(
        [params["bq"] * inv_sqrt_dk, params["bk"], params["bv"]], axis=1)
    gamma, beta = params["gamma"], params["beta"]
    wo3 = params["wo"].reshape(num_head, dim_head, H).astype(cdt)
    bo = params["bo"]
    w1, b1 = params["w1"].astype(cdt), params["b1"]
    w2, b2 = params["w2"].astype(cdt), params["b2"]
    consts = (gamma, beta, wqkv, bqkv, wo3, bo, w1, b1, w2, b2)

    kern = functools.partial(encoder_kernel, num_head=num_head,
                             dim_head=dim_head, tq=tq, fast_math=fast_math)

    flops = 2 * B * S * H * (6 * H + 2 * S)
    transcendentals = B * S * (num_head * S + H)
    bytes_accessed = (2 * int(x.size) * x.dtype.itemsize
                      + sum(int(a.size) * a.dtype.itemsize for a in consts))
    cost = pl.CostEstimate(flops=flops, transcendentals=transcendentals,
                           bytes_accessed=bytes_accessed)

    def build(single_buffer):
        def spec(shape, index_map):
            if single_buffer:
                return pl.BlockSpec(shape, index_map,
                                    pipeline_mode=pl.Buffered(buffer_count=1))
            return pl.BlockSpec(shape, index_map)

        in_specs = [spec((1, S, H), lambda b, q: (b, 0, 0))]       # x, full seq
        in_specs += [spec(a.shape, lambda b, q, _n=a.ndim: (0,) * _n)
                     for a in consts]                              # grid-invariant

        return pl.pallas_call(
            kern,
            out_shape=jax.ShapeDtypeStruct((B, S, H), x.dtype),
            grid=(B, nq),
            in_specs=in_specs,
            out_specs=pl.BlockSpec((1, tq, H), lambda b, q: (b, q, 0)),
            scratch_shapes=[
                pltpu.VMEM((num_head, S, dim_head), cdt),  # Q (pre-scaled), head-major
                pltpu.VMEM((num_head, S, dim_head), cdt),  # K, head-major
                pltpu.VMEM((num_head, S, dim_head), cdt),  # V, head-major
            ],
            compiler_params=pltpu.CompilerParams(
                dimension_semantics=("parallel", "arbitrary"),
                vmem_limit_bytes=vmem_limit),
            cost_estimate=cost,
        )

    # Prefer single-buffered invariant operands (saves ~6*H^2*cdt bytes + the
    # duplicated full-sequence x); fall back to default double buffering on
    # jax versions that reject pl.Buffered(1) in pallas_call BlockSpecs.
    try:
        return build(single_buffer=True)(x, *consts)
    except Exception:  # pragma: no cover - compatibility fallback
        return build(single_buffer=False)(x, *consts)


# --------------------------- pure-JAX reference ----------------------------
def encoder_ref(x, params, num_head):
    B, S, H = x.shape
    dh = H // num_head

    def ln(z):
        mean = jnp.mean(z, axis=-1, keepdims=True)
        var = jnp.mean((z - mean) ** 2, axis=-1, keepdims=True)
        return (z - mean) / jnp.sqrt(var + EPS) * params["gamma"] + params["beta"]

    ln1 = ln(x)
    q = ln1 @ params["wq"] + params["bq"]
    k = ln1 @ params["wk"] + params["bk"]
    v = ln1 @ params["wv"] + params["bv"]
    qh = q.reshape(B, S, num_head, dh)
    kh = k.reshape(B, S, num_head, dh)
    vh = v.reshape(B, S, num_head, dh)
    scores = jnp.einsum("bsnd,btnd->bnst", qh, kh) / jnp.sqrt(jnp.float32(dh))
    probs = jax.nn.softmax(scores, axis=-1)
    heads = jnp.einsum("bnst,btnd->bsnd", probs, vh).reshape(B, S, H)
    att_out = heads @ params["wo"] + params["bo"]
    x1 = x + att_out

    ln2 = ln(x1)
    h1 = jax.nn.gelu(ln2 @ params["w1"] + params["b1"], approximate=False)
    ffn = h1 @ params["w2"] + params["b2"]
    return x1 + ffn


# ----------------------------------- main -----------------------------------
if __name__ == "__main__":
    B, S, H = 2, 8, 32
    NUM_HEAD = 4

    key = jax.random.PRNGKey(0)
    keys = jax.random.split(key, 16)

    def w(k, shape, scale=0.1):
        return (scale * jax.random.normal(k, shape)).astype(jnp.float32)

    params = {
        "gamma": w(keys[0], (1, H), 0.2) + 1.0,   # LayerNorm weight (shared)
        "beta":  w(keys[1], (1, H), 0.1),         # LayerNorm bias   (shared)
        # per-head Lin1/Lin2/Lin3 stacked head-major along the output axis
        "wq": w(keys[2], (H, H)), "bq": w(keys[3], (1, H)),
        "wk": w(keys[4], (H, H)), "bk": w(keys[5], (1, H)),
        "wv": w(keys[6], (H, H)), "bv": w(keys[7], (1, H)),
        "wo": w(keys[8], (H, H)), "bo": w(keys[9], (1, H)),
        "w1": w(keys[10], (H, H)), "b1": w(keys[11], (1, H)),
        "w2": w(keys[12], (H, H)), "b2": w(keys[13], (1, H)),
    }

    x = jax.random.normal(keys[14], (B, S, H), dtype=jnp.float32)

    ref = jax.block_until_ready(encoder_ref(x, params, NUM_HEAD))

    # f32 compute path: strict parity with the module semantics.
    out = jax.block_until_ready(encoder_layers(x, params, NUM_HEAD))
    assert out.shape == (B, S, H)
    assert jnp.allclose(out, ref, atol=1e-4, rtol=1e-4), (
        float(jnp.max(jnp.abs(out - ref))))

    # bf16 MXU fast path (f32 accumulation, f32 LN/softmax stats, approx recip).
    out_bf16 = jax.block_until_ready(
        encoder_layers(x, params, NUM_HEAD, compute_dtype=jnp.bfloat16))
    assert jnp.allclose(out_bf16, ref, atol=5e-2, rtol=5e-2), (
        float(jnp.max(jnp.abs(out_bf16 - ref))))

    print("KERNEL_OK")
</pallas_src>

<mosaic_0001>
module attributes {stable_mosaic.version = 11 : i64} {
  func.func @encoder_kernel(%arg0: i32, %arg1: i32, %arg2: memref<1x8x32xf32, #tpu.memory_space<vmem>>, %arg3: memref<1x32xf32, #tpu.memory_space<vmem>>, %arg4: memref<1x32xf32, #tpu.memory_space<vmem>>, %arg5: memref<32x96xf32, #tpu.memory_space<vmem>>, %arg6: memref<1x96xf32, #tpu.memory_space<vmem>>, %arg7: memref<4x8x32xf32, #tpu.memory_space<vmem>>, %arg8: memref<1x32xf32, #tpu.memory_space<vmem>>, %arg9: memref<32x32xf32, #tpu.memory_space<vmem>>, %arg10: memref<1x32xf32, #tpu.memory_space<vmem>>, %arg11: memref<32x32xf32, #tpu.memory_space<vmem>>, %arg12: memref<1x32xf32, #tpu.memory_space<vmem>>, %arg13: memref<1x8x32xf32, #tpu.memory_space<vmem>>, %arg14: memref<4x8x8xf32, #tpu.memory_space<vmem>>, %arg15: memref<4x8x8xf32, #tpu.memory_space<vmem>>, %arg16: memref<4x8x8xf32, #tpu.memory_space<vmem>>) attributes {dimension_semantics = [#tpu.dimension_semantics<parallel>, #tpu.dimension_semantics<arbitrary>], iteration_bounds = array<i64: 2, 1>, scalar_prefetch = 0 : i64, scratch_operands = 3 : i64, tpu.core_type = #tpu.core_type<tc>, window_params = [{pipeline_mode = #tpu.pipeline_mode<synchronous>, transform_indices = @transform_0, window_bounds = array<i64: 1, 8, 32>}, {pipeline_mode = #tpu.pipeline_mode<synchronous>, transform_indices = @transform_1, window_bounds = array<i64: 1, 32>}, {pipeline_mode = #tpu.pipeline_mode<synchronous>, transform_indices = @transform_2, window_bounds = array<i64: 1, 32>}, {pipeline_mode = #tpu.pipeline_mode<synchronous>, transform_indices = @transform_3, window_bounds = array<i64: 32, 96>}, {pipeline_mode = #tpu.pipeline_mode<synchronous>, transform_indices = @transform_4, window_bounds = array<i64: 1, 96>}, {pipeline_mode = #tpu.pipeline_mode<synchronous>, transform_indices = @transform_5, window_bounds = array<i64: 4, 8, 32>}, {pipeline_mode = #tpu.pipeline_mode<synchronous>, transform_indices = @transform_6, window_bounds = array<i64: 1, 32>}, {pipeline_mode = #tpu.pipeline_mode<synchronous>, transform_indices = @transform_7, window_bounds = array<i64: 32, 32>}, {pipeline_mode = #tpu.pipeline_mode<synchronous>, transform_indices = @transform_8, window_bounds = array<i64: 1, 32>}, {pipeline_mode = #tpu.pipeline_mode<synchronous>, transform_indices = @transform_9, window_bounds = array<i64: 32, 32>}, {pipeline_mode = #tpu.pipeline_mode<synchronous>, transform_indices = @transform_10, window_bounds = array<i64: 1, 32>}, {transform_indices = @transform_11, window_bounds = array<i64: 1, 8, 32>}]} {
    %c0 = arith.constant 0 : index
    %c0_0 = arith.constant 0 : index
    %0 = vector.load %arg3[%c0, %c0_0] : memref<1x32xf32, #tpu.memory_space<vmem>>, vector<1x32xf32>
    %c0_1 = arith.constant 0 : index
    %c0_2 = arith.constant 0 : index
    %1 = vector.load %arg4[%c0_1, %c0_2] : memref<1x32xf32, #tpu.memory_space<vmem>>, vector<1x32xf32>
    %c0_i32 = arith.constant 0 : i32
    %2 = arith.cmpi eq, %arg1, %c0_i32 : i32
    %3 = arith.extui %2 : i1 to i32
    %c0_i32_3 = arith.constant 0 : i32
    %4 = arith.cmpi ne, %3, %c0_i32_3 : i32
    scf.if %4 {
      %c0_44 = arith.constant 0 : index
      %c0_45 = arith.constant 0 : index
      %c0_46 = arith.constant 0 : index
      %87 = vector.load %arg2[%c0_44, %c0_45, %c0_46] : memref<1x8x32xf32, #tpu.memory_space<vmem>>, vector<1x8x32xf32>
      %88 = vector.shape_cast %87 : vector<1x8x32xf32> to vector<8x32xf32>
      %cst_47 = arith.constant dense<0.000000e+00> : vector<8xf32>
      %89 = vector.multi_reduction <add>, %88, %cst_47 [1] : vector<8x32xf32> to vector<8xf32>
      %90 = vector.shape_cast %89 : vector<8xf32> to vector<8x1xf32>
      %cst_48 = arith.constant 3.200000e+01 : f32
      %91 = vector.broadcast %cst_48 : f32 to vector<8x1xf32>
      %92 = arith.divf %90, %91 : vector<8x1xf32>
      %93 = vector.broadcast %92 : vector<8x1xf32> to vector<8x32xf32>
      %94 = arith.subf %88, %93 : vector<8x32xf32>
      %95 = arith.mulf %94, %94 : vector<8x32xf32>
      %cst_49 = arith.constant dense<0.000000e+00> : vector<8xf32>
      %96 = vector.multi_reduction <add>, %95, %cst_49 [1] : vector<8x32xf32> to vector<8xf32>
      %97 = vector.shape_cast %96 : vector<8xf32> to vector<8x1xf32>
      %cst_50 = arith.constant 3.200000e+01 : f32
      %98 = vector.broadcast %cst_50 : f32 to vector<8x1xf32>
      %99 = arith.divf %97, %98 : vector<8x1xf32>
      %100 = vector.broadcast %92 : vector<8x1xf32> to vector<8x32xf32>
      %101 = arith.subf %88, %100 : vector<8x32xf32>
      %cst_51 = arith.constant 9.99999974E-6 : f32
      %102 = vector.broadcast %cst_51 : f32 to vector<8x1xf32>
      %103 = arith.addf %99, %102 : vector<8x1xf32>
      %104 = math.rsqrt %103 : vector<8x1xf32>
      %105 = vector.broadcast %104 : vector<8x1xf32> to vector<8x32xf32>
      %106 = arith.mulf %101, %105 : vector<8x32xf32>
      %107 = vector.broadcast %0 : vector<1x32xf32> to vector<8x32xf32>
      %108 = arith.mulf %106, %107 : vector<8x32xf32>
      %109 = vector.broadcast %1 : vector<1x32xf32> to vector<8x32xf32>
      %110 = arith.addf %108, %109 : vector<8x32xf32>
      %c0_52 = arith.constant 0 : index
      %c0_53 = arith.constant 0 : index
      %111 = vector.load %arg5[%c0_52, %c0_53] : memref<32x96xf32, #tpu.memory_space<vmem>>, vector<32x96xf32>
      %cst_54 = arith.constant dense<0.000000e+00> : vector<8x96xf32>
      %112 = tpu.matmul %110, %111, %cst_54 {dimension_numbers = #tpu.dot_dimension_numbers<[1], [0], [0], [1], [0, 0, 1, 1], [], []>} : vector<8x32xf32>, vector<32x96xf32>, vector<8x96xf32> -> vector<8x96xf32>
      %c0_55 = arith.constant 0 : index
      %c0_56 = arith.constant 0 : index
      %113 = vector.load %arg6[%c0_55, %c0_56] : memref<1x96xf32, #tpu.memory_space<vmem>>, vector<1x96xf32>
      %114 = vector.broadcast %113 : vector<1x96xf32> to vector<8x96xf32>
      %115 = arith.addf %112, %114 : vector<8x96xf32>
      %116 = vector.extract_strided_slice %115 {offsets = [0, 0], sizes = [8, 32], strides = [1, 1]} : vector<8x96xf32> to vector<8x32xf32>
      %117 = vector.extract_strided_slice %115 {offsets = [0, 32], sizes = [8, 32], strides = [1, 1]} : vector<8x96xf32> to vector<8x32xf32>
      %118 = vector.extract_strided_slice %115 {offsets = [0, 64], sizes = [8, 32], strides = [1, 1]} : vector<8x96xf32> to vector<8x32xf32>
      %119 = vector.extract_strided_slice %116 {offsets = [0, 0], sizes = [8, 8], strides = [1, 1]} : vector<8x32xf32> to vector<8x8xf32>
      %c0_57 = arith.constant 0 : index
      %c0_58 = arith.constant 0 : index
      %c0_59 = arith.constant 0 : index
      %120 = vector.load %arg14[%c0_57, %c0_58, %c0_59] : memref<4x8x8xf32, #tpu.memory_space<vmem>>, vector<1x8x8xf32>
      %121 = vector.shape_cast %120 : vector<1x8x8xf32> to vector<8x8xf32>
      %122 = vector.shape_cast %119 : vector<8x8xf32> to vector<1x8x8xf32>
      tpu.vector_store %arg14[%c0_57, %c0_58, %c0_59], %122 {strides = array<i32>} : memref<4x8x8xf32, #tpu.memory_space<vmem>>, vector<1x8x8xf32>,
      %123 = vector.extract_strided_slice %117 {offsets = [0, 0], sizes = [8, 8], strides = [1, 1]} : vector<8x32xf32> to vector<8x8xf32>
      %c0_60 = arith.constant 0 : index
      %c0_61 = arith.constant 0 : index
      %c0_62 = arith.constant 0 : index
      %124 = vector.load %arg15[%c0_60, %c0_61, %c0_62] : memref<4x8x8xf32, #tpu.memory_space<vmem>>, vector<1x8x8xf32>
      %125 = vector.shape_cast %124 : vector<1x8x8xf32> to vector<8x8xf32>
      %126 = vector.shape_cast %123 : vector<8x8xf32> to vector<1x8x8xf32>
      tpu.vector_store %arg15[%c0_60, %c0_61, %c0_62], %126 {strides = array<i32>} : memref<4x8x8xf32, #tpu.memory_space<vmem>>, vector<1x8x8xf32>,
      %127 = vector.extract_strided_slice %118 {offsets = [0, 0], sizes = [8, 8], strides = [1, 1]} : vector<8x32xf32> to vector<8x8xf32>
      %c0_63 = arith.constant 0 : index
      %c0_64 = arith.constant 0 : index
      %c0_65 = arith.constant 0 : index
      %128 = vector.load %arg16[%c0_63, %c0_64, %c0_65] : memref<4x8x8xf32, #tpu.memory_space<vmem>>, vector<1x8x8xf32>
      %129 = vector.shape_cast %128 : vector<1x8x8xf32> to vector<8x8xf32>
      %130 = vector.shape_cast %127 : vector<8x8xf32> to vector<1x8x8xf32>
      tpu.vector_store %arg16[%c0_63, %c0_64, %c0_65], %130 {strides = array<i32>} : memref<4x8x8xf32, #tpu.memory_space<vmem>>, vector<1x8x8xf32>,
      %131 = vector.extract_strided_slice %116 {offsets = [0, 8], sizes = [8, 8], strides = [1, 1]} : vector<8x32xf32> to vector<8x8xf32>
      %c1 = arith.constant 1 : index
      %c0_66 = arith.constant 0 : index
      %c0_67 = arith.constant 0 : index
      %132 = vector.load %arg14[%c1, %c0_66, %c0_67] : memref<4x8x8xf32, #tpu.memory_space<vmem>>, vector<1x8x8xf32>
      %133 = vector.shape_cast %132 : vector<1x8x8xf32> to vector<8x8xf32>
      %134 = vector.shape_cast %131 : vector<8x8xf32> to vector<1x8x8xf32>
      tpu.vector_store %arg14[%c1, %c0_66, %c0_67], %134 {strides = array<i32>} : memref<4x8x8xf32, #tpu.memory_space<vmem>>, vector<1x8x8xf32>,
      %135 = vector.extract_strided_slice %117 {offsets = [0, 8], sizes = [8, 8], strides = [1, 1]} : vector<8x32xf32> to vector<8x8xf32>
      %c1_68 = arith.constant 1 : index
      %c0_69 = arith.constant 0 : index
      %c0_70 = arith.constant 0 : index
      %136 = vector.load %arg15[%c1_68, %c0_69, %c0_70] : memref<4x8x8xf32, #tpu.memory_space<vmem>>, vector<1x8x8xf32>
      %137 = vector.shape_cast %136 : vector<1x8x8xf32> to vector<8x8xf32>
      %138 = vector.shape_cast %135 : vector<8x8xf32> to vector<1x8x8xf32>
      tpu.vector_store %arg15[%c1_68, %c0_69, %c0_70], %138 {strides = array<i32>} : memref<4x8x8xf32, #tpu.memory_space<vmem>>, vector<1x8x8xf32>,
      %139 = vector.extract_strided_slice %118 {offsets = [0, 8], sizes = [8, 8], strides = [1, 1]} : vector<8x32xf32> to vector<8x8xf32>
      %c1_71 = arith.constant 1 : index
      %c0_72 = arith.constant 0 : index
      %c0_73 = arith.constant 0 : index
      %140 = vector.load %arg16[%c1_71, %c0_72, %c0_73] : memref<4x8x8xf32, #tpu.memory_space<vmem>>, vector<1x8x8xf32>
      %141 = vector.shape_cast %140 : vector<1x8x8xf32> to vector<8x8xf32>
      %142 = vector.shape_cast %139 : vector<8x8xf32> to vector<1x8x8xf32>
      tpu.vector_store %arg16[%c1_71, %c0_72, %c0_73], %142 {strides = array<i32>} : memref<4x8x8xf32, #tpu.memory_space<vmem>>, vector<1x8x8xf32>,
      %143 = vector.extract_strided_slice %116 {offsets = [0, 16], sizes = [8, 8], strides = [1, 1]} : vector<8x32xf32> to vector<8x8xf32>
      %c2 = arith.constant 2 : index
      %c0_74 = arith.constant 0 : index
      %c0_75 = arith.constant 0 : index
      %144 = vector.load %arg14[%c2, %c0_74, %c0_75] : memref<4x8x8xf32, #tpu.memory_space<vmem>>, vector<1x8x8xf32>
      %145 = vector.shape_cast %144 : vector<1x8x8xf32> to vector<8x8xf32>
      %146 = vector.shape_cast %143 : vector<8x8xf32> to vector<1x8x8xf32>
      tpu.vector_store %arg14[%c2, %c0_74, %c0_75], %146 {strides = array<i32>} : memref<4x8x8xf32, #tpu.memory_space<vmem>>, vector<1x8x8xf32>,
      %147 = vector.extract_strided_slice %117 {offsets = [0, 16], sizes = [8, 8], strides = [1, 1]} : vector<8x32xf32> to vector<8x8xf32>
      %c2_76 = arith.constant 2 : index
      %c0_77 = arith.constant 0 : index
      %c0_78 = arith.constant 0 : index
      %148 = vector.load %arg15[%c2_76, %c0_77, %c0_78] : memref<4x8x8xf32, #tpu.memory_space<vmem>>, vector<1x8x8xf32>
      %149 = vector.shape_cast %148 : vector<1x8x8xf32> to vector<8x8xf32>
      %150 = vector.shape_cast %147 : vector<8x8xf32> to vector<1x8x8xf32>
      tpu.vector_store %arg15[%c2_76, %c0_77, %c0_78], %150 {strides = array<i32>} : memref<4x8x8xf32, #tpu.memory_space<vmem>>, vector<1x8x8xf32>,
      %151 = vector.extract_strided_slice %118 {offsets = [0, 16], sizes = [8, 8], strides = [1, 1]} : vector<8x32xf32> to vector<8x8xf32>
      %c2_79 = arith.constant 2 : index
      %c0_80 = arith.constant 0 : index
      %c0_81 = arith.constant 0 : index
      %152 = vector.load %arg16[%c2_79, %c0_80, %c0_81] : memref<4x8x8xf32, #tpu.memory_space<vmem>>, vector<1x8x8xf32>
      %153 = vector.shape_cast %152 : vector<1x8x8xf32> to vector<8x8xf32>
      %154 = vector.shape_cast %151 : vector<8x8xf32> to vector<1x8x8xf32>
      tpu.vector_store %arg16[%c2_79, %c0_80, %c0_81], %154 {strides = array<i32>} : memref<4x8x8xf32, #tpu.memory_space<vmem>>, vector<1x8x8xf32>,
      %155 = vector.extract_strided_slice %116 {offsets = [0, 24], sizes = [8, 8], strides = [1, 1]} : vector<8x32xf32> to vector<8x8xf32>
      %c3 = arith.constant 3 : index
      %c0_82 = arith.constant 0 : index
      %c0_83 = arith.constant 0 : index
      %156 = vector.load %arg14[%c3, %c0_82, %c0_83] : memref<4x8x8xf32, #tpu.memory_space<vmem>>, vector<1x8x8xf32>
      %157 = vector.shape_cast %156 : vector<1x8x8xf32> to vector<8x8xf32>
      %158 = vector.shape_cast %155 : vector<8x8xf32> to vector<1x8x8xf32>
      tpu.vector_store %arg14[%c3, %c0_82, %c0_83], %158 {strides = array<i32>} : memref<4x8x8xf32, #tpu.memory_space<vmem>>, vector<1x8x8xf32>,
      %159 = vector.extract_strided_slice %117 {offsets = [0, 24], sizes = [8, 8], strides = [1, 1]} : vector<8x32xf32> to vector<8x8xf32>
      %c3_84 = arith.constant 3 : index
      %c0_85 = arith.constant 0 : index
      %c0_86 = arith.constant 0 : index
      %160 = vector.load %arg15[%c3_84, %c0_85, %c0_86] : memref<4x8x8xf32, #tpu.memory_space<vmem>>, vector<1x8x8xf32>
      %161 = vector.shape_cast %160 : vector<1x8x8xf32> to vector<8x8xf32>
      %162 = vector.shape_cast %159 : vector<8x8xf32> to vector<1x8x8xf32>
      tpu.vector_store %arg15[%c3_84, %c0_85, %c0_86], %162 {strides = array<i32>} : memref<4x8x8xf32, #tpu.memory_space<vmem>>, vector<1x8x8xf32>,
      %163 = vector.extract_strided_slice %118 {offsets = [0, 24], sizes = [8, 8], strides = [1, 1]} : vector<8x32xf32> to vector<8x8xf32>
      %c3_87 = arith.constant 3 : index
      %c0_88 = arith.constant 0 : index
      %c0_89 = arith.constant 0 : index
      %164 = vector.load %arg16[%c3_87, %c0_88, %c0_89] : memref<4x8x8xf32, #tpu.memory_space<vmem>>, vector<1x8x8xf32>
      %165 = vector.shape_cast %164 : vector<1x8x8xf32> to vector<8x8xf32>
      %166 = vector.shape_cast %163 : vector<8x8xf32> to vector<1x8x8xf32>
      tpu.vector_store %arg16[%c3_87, %c0_88, %c0_89], %166 {strides = array<i32>} : memref<4x8x8xf32, #tpu.memory_space<vmem>>, vector<1x8x8xf32>,
    } else {
    }
    %c8_i32 = arith.constant 8 : i32
    %5 = arith.muli %arg1, %c8_i32 : i32
    %6 = tpu.assume_multiple %5, 8 : i32
    %c0_4 = arith.constant 0 : index
    %7 = arith.index_cast %6 : i32 to index
    %c0_5 = arith.constant 0 : index
    %8 = vector.load %arg2[%c0_4, %7, %c0_5] : memref<1x8x32xf32, #tpu.memory_space<vmem>>, vector<1x8x32xf32>
    %9 = vector.shape_cast %8 : vector<1x8x32xf32> to vector<8x32xf32>
    %c0_6 = arith.constant 0 : index
    %10 = arith.index_cast %6 : i32 to index
    %c0_7 = arith.constant 0 : index
    %11 = vector.load %arg14[%c0_6, %10, %c0_7] : memref<4x8x8xf32, #tpu.memory_space<vmem>>, vector<4x8x8xf32>
    %c0_8 = arith.constant 0 : index
    %c0_9 = arith.constant 0 : index
    %c0_10 = arith.constant 0 : index
    %12 = vector.load %arg15[%c0_8, %c0_9, %c0_10] : memref<4x8x8xf32, #tpu.memory_space<vmem>>, vector<4x8x8xf32>
    "tpu.trace_start"() <{level = 10 : i32, message = "hqd,hkd->hqk"}> : () -> ()
    %cst = arith.constant dense<0.000000e+00> : vector<4x8x8xf32>
    %13 = tpu.matmul %11, %12, %cst {dimension_numbers = #tpu.dot_dimension_numbers<[2], [2], [1], [1], [0, 0, 0, 1, 1, 1], [0], [0]>} : vector<4x8x8xf32>, vector<4x8x8xf32>, vector<4x8x8xf32> -> vector<4x8x8xf32>
    "tpu.trace_stop"() : () -> ()
    %cst_11 = arith.constant dense<0xFF800000> : vector<4x8xf32>
    %14 = vector.multi_reduction <maximumf>, %13, %cst_11 [2] : vector<4x8x8xf32> to vector<4x8xf32>
    %15 = vector.shape_cast %14 : vector<4x8xf32> to vector<4x8x1xf32>
    %16 = vector.broadcast %15 : vector<4x8x1xf32> to vector<4x8x8xf32>
    %17 = arith.subf %13, %16 : vector<4x8x8xf32>
    %18 = math.exp %17 : vector<4x8x8xf32>
    %cst_12 = arith.constant dense<0.000000e+00> : vector<4x8xf32>
    %19 = vector.multi_reduction <add>, %18, %cst_12 [2] : vector<4x8x8xf32> to vector<4x8xf32>
    %20 = vector.shape_cast %19 : vector<4x8xf32> to vector<4x8x1xf32>
    %21 = tpu.reciprocal %20 : vector<4x8x1xf32> -> vector<4x8x1xf32>
    %22 = vector.broadcast %21 : vector<4x8x1xf32> to vector<4x8x8xf32>
    %23 = arith.mulf %18, %22 : vector<4x8x8xf32>
    %c0_13 = arith.constant 0 : index
    %c0_14 = arith.constant 0 : index
    %c0_15 = arith.constant 0 : index
    %24 = vector.load %arg16[%c0_13, %c0_14, %c0_15] : memref<4x8x8xf32, #tpu.memory_space<vmem>>, vector<4x8x8xf32>
    "tpu.trace_start"() <{level = 10 : i32, message = "hqk,hkd->hqd"}> : () -> ()
    %cst_16 = arith.constant dense<0.000000e+00> : vector<4x8x8xf32>
    %25 = tpu.matmul %23, %24, %cst_16 {dimension_numbers = #tpu.dot_dimension_numbers<[2], [1], [1], [2], [0, 0, 0, 1, 1, 2], [0], [0]>} : vector<4x8x8xf32>, vector<4x8x8xf32>, vector<4x8x8xf32> -> vector<4x8x8xf32>
    "tpu.trace_stop"() : () -> ()
    %c0_17 = arith.constant 0 : index
    %c0_18 = arith.constant 0 : index
    %c0_19 = arith.constant 0 : index
    %26 = vector.load %arg7[%c0_17, %c0_18, %c0_19] : memref<4x8x32xf32, #tpu.memory_space<vmem>>, vector<4x8x32xf32>
    "tpu.trace_start"() <{level = 10 : i32, message = "hqd,hdn->hqn"}> : () -> ()
    %cst_20 = arith.constant dense<0.000000e+00> : vector<4x8x32xf32>
    %27 = tpu.matmul %25, %26, %cst_20 {dimension_numbers = #tpu.dot_dimension_numbers<[2], [1], [1], [2], [0, 0, 0, 1, 1, 2], [0], [0]>} : vector<4x8x8xf32>, vector<4x8x32xf32>, vector<4x8x32xf32> -> vector<4x8x32xf32>
    "tpu.trace_stop"() : () -> ()
    %c0_21 = arith.constant 0 : index
    %c0_22 = arith.constant 0 : index
    %28 = vector.load %arg8[%c0_21, %c0_22] : memref<1x32xf32, #tpu.memory_space<vmem>>, vector<1x32xf32>
    %29 = vector.extract_strided_slice %27 {offsets = [0, 0, 0], sizes = [1, 8, 32], strides = [1, 1, 1]} : vector<4x8x32xf32> to vector<1x8x32xf32>
    %30 = vector.shape_cast %29 : vector<1x8x32xf32> to vector<8x32xf32>
    %31 = vector.broadcast %28 : vector<1x32xf32> to vector<8x32xf32>
    %32 = arith.addf %31, %30 : vector<8x32xf32>
    %33 = vector.extract_strided_slice %27 {offsets = [1, 0, 0], sizes = [1, 8, 32], strides = [1, 1, 1]} : vector<4x8x32xf32> to vector<1x8x32xf32>
    %34 = vector.shape_cast %33 : vector<1x8x32xf32> to vector<8x32xf32>
    %35 = arith.addf %32, %34 : vector<8x32xf32>
    %36 = vector.extract_strided_slice %27 {offsets = [2, 0, 0], sizes = [1, 8, 32], strides = [1, 1, 1]} : vector<4x8x32xf32> to vector<1x8x32xf32>
    %37 = vector.shape_cast %36 : vector<1x8x32xf32> to vector<8x32xf32>
    %38 = arith.addf %35, %37 : vector<8x32xf32>
    %39 = vector.extract_strided_slice %27 {offsets = [3, 0, 0], sizes = [1, 8, 32], strides = [1, 1, 1]} : vector<4x8x32xf32> to vector<1x8x32xf32>
    %40 = vector.shape_cast %39 : vector<1x8x32xf32> to vector<8x32xf32>
    %41 = arith.addf %38, %40 : vector<8x32xf32>
    %42 = arith.addf %9, %41 : vector<8x32xf32>
    %cst_23 = arith.constant dense<0.000000e+00> : vector<8xf32>
    %43 = vector.multi_reduction <add>, %42, %cst_23 [1] : vector<8x32xf32> to vector<8xf32>
    %44 = vector.shape_cast %43 : vector<8xf32> to vector<8x1xf32>
    %cst_24 = arith.constant 3.200000e+01 : f32
    %45 = vector.broadcast %cst_24 : f32 to vector<8x1xf32>
    %46 = arith.divf %44, %45 : vector<8x1xf32>
    %47 = vector.broadcast %46 : vector<8x1xf32> to vector<8x32xf32>
    %48 = arith.subf %42, %47 : vector<8x32xf32>
    %49 = arith.mulf %48, %48 : vector<8x32xf32>
    %cst_25 = arith.constant dense<0.000000e+00> : vector<8xf32>
    %50 = vector.multi_reduction <add>, %49, %cst_25 [1] : vector<8x32xf32> to vector<8xf32>
    %51 = vector.shape_cast %50 : vector<8xf32> to vector<8x1xf32>
    %cst_26 = arith.constant 3.200000e+01 : f32
    %52 = vector.broadcast %cst_26 : f32 to vector<8x1xf32>
    %53 = arith.divf %51, %52 : vector<8x1xf32>
    %54 = vector.broadcast %46 : vector<8x1xf32> to vector<8x32xf32>
    %55 = arith.subf %42, %54 : vector<8x32xf32>
    %cst_27 = arith.constant 9.99999974E-6 : f32
    %56 = vector.broadcast %cst_27 : f32 to vector<8x1xf32>
    %57 = arith.addf %53, %56 : vector<8x1xf32>
    %58 = math.rsqrt %57 : vector<8x1xf32>
    %59 = vector.broadcast %58 : vector<8x1xf32> to vector<8x32xf32>
    %60 = arith.mulf %55, %59 : vector<8x32xf32>
    %61 = vector.broadcast %0 : vector<1x32xf32> to vector<8x32xf32>
    %62 = arith.mulf %60, %61 : vector<8x32xf32>
    %63 = vector.broadcast %1 : vector<1x32xf32> to vector<8x32xf32>
    %64 = arith.addf %62, %63 : vector<8x32xf32>
    %c0_28 = arith.constant 0 : index
    %c0_29 = arith.constant 0 : index
    %65 = vector.load %arg9[%c0_28, %c0_29] : memref<32x32xf32, #tpu.memory_space<vmem>>, vector<32x32xf32>
    %cst_30 = arith.constant dense<0.000000e+00> : vector<8x32xf32>
    %66 = tpu.matmul %64, %65, %cst_30 {dimension_numbers = #tpu.dot_dimension_numbers<[1], [0], [0], [1], [0, 0, 1, 1], [], []>} : vector<8x32xf32>, vector<32x32xf32>, vector<8x32xf32> -> vector<8x32xf32>
    %c0_31 = arith.constant 0 : index
    %c0_32 = arith.constant 0 : index
    %67 = vector.load %arg10[%c0_31, %c0_32] : memref<1x32xf32, #tpu.memory_space<vmem>>, vector<1x32xf32>
    %68 = vector.broadcast %67 : vector<1x32xf32> to vector<8x32xf32>
    %69 = arith.addf %66, %68 : vector<8x32xf32>
    %cst_33 = arith.constant 5.000000e-01 : f32
    %70 = vector.broadcast %cst_33 : f32 to vector<8x32xf32>
    %71 = arith.mulf %70, %69 : vector<8x32xf32>
    %cst_34 = arith.constant 0.707106769 : f32
    %72 = vector.broadcast %cst_34 : f32 to vector<8x32xf32>
    %73 = arith.mulf %69, %72 : vector<8x32xf32>
    %74 = math.erf %73 : vector<8x32xf32>
    %cst_35 = arith.constant 1.000000e+00 : f32
    %75 = vector.broadcast %cst_35 : f32 to vector<8x32xf32>
    %76 = arith.addf %75, %74 : vector<8x32xf32>
    %77 = arith.mulf %71, %76 : vector<8x32xf32>
    %c0_36 = arith.constant 0 : index
    %c0_37 = arith.constant 0 : index
    %78 = vector.load %arg11[%c0_36, %c0_37] : memref<32x32xf32, #tpu.memory_space<vmem>>, vector<32x32xf32>
    %cst_38 = arith.constant dense<0.000000e+00> : vector<8x32xf32>
    %79 = tpu.matmul %77, %78, %cst_38 {dimension_numbers = #tpu.dot_dimension_numbers<[1], [0], [0], [1], [0, 0, 1, 1], [], []>} : vector<8x32xf32>, vector<32x32xf32>, vector<8x32xf32> -> vector<8x32xf32>
    %c0_39 = arith.constant 0 : index
    %c0_40 = arith.constant 0 : index
    %80 = vector.load %arg12[%c0_39, %c0_40] : memref<1x32xf32, #tpu.memory_space<vmem>>, vector<1x32xf32>
    %81 = vector.broadcast %80 : vector<1x32xf32> to vector<8x32xf32>
    %82 = arith.addf %79, %81 : vector<8x32xf32>
    %83 = arith.addf %42, %82 : vector<8x32xf32>
    %c0_41 = arith.constant 0 : index
    %c0_42 = arith.constant 0 : index
    %c0_43 = arith.constant 0 : index
    %84 = vector.load %arg13[%c0_41, %c0_42, %c0_43] : memref<1x8x32xf32, #tpu.memory_space<vmem>>, vector<1x8x32xf32>
    %85 = vector.shape_cast %84 : vector<1x8x32xf32> to vector<8x32xf32>
    %86 = vector.shape_cast %83 : vector<8x32xf32> to vector<1x8x32xf32>
    tpu.vector_store %arg13[%c0_41, %c0_42, %c0_43], %86 {strides = array<i32>} : memref<1x8x32xf32, #tpu.memory_space<vmem>>, vector<1x8x32xf32>,
    return
  }
  func.func @transform_0(%arg0: i32, %arg1: i32) -> (i32, i32, i32) {
    %c0_i32 = arith.constant 0 : i32
    %c0_i32_0 = arith.constant 0 : i32
    %c0_i32_1 = arith.constant 0 : i32
    return %arg0, %c0_i32, %c0_i32_0 : i32, i32, i32
  }
  func.func @transform_1(%arg0: i32, %arg1: i32) -> (i32, i32) {
    %c0_i32 = arith.constant 0 : i32
    %c0_i32_0 = arith.constant 0 : i32
    %c0_i32_1 = arith.constant 0 : i32
    return %c0_i32, %c0_i32_0 : i32, i32
  }
  func.func @transform_2(%arg0: i32, %arg1: i32) -> (i32, i32) {
    %c0_i32 = arith.constant 0 : i32
    %c0_i32_0 = arith.constant 0 : i32
    %c0_i32_1 = arith.constant 0 : i32
    return %c0_i32, %c0_i32_0 : i32, i32
  }
  func.func @transform_3(%arg0: i32, %arg1: i32) -> (i32, i32) {
    %c0_i32 = arith.constant 0 : i32
    %c0_i32_0 = arith.constant 0 : i32
    %c0_i32_1 = arith.constant 0 : i32
    return %c0_i32, %c0_i32_0 : i32, i32
  }
  func.func @transform_4(%arg0: i32, %arg1: i32) -> (i32, i32) {
    %c0_i32 = arith.constant 0 : i32
    %c0_i32_0 = arith.constant 0 : i32
    %c0_i32_1 = arith.constant 0 : i32
    return %c0_i32, %c0_i32_0 : i32, i32
  }
  func.func @transform_5(%arg0: i32, %arg1: i32) -> (i32, i32, i32) {
    %c0_i32 = arith.constant 0 : i32
    %c0_i32_0 = arith.constant 0 : i32
    %c0_i32_1 = arith.constant 0 : i32
    %c0_i32_2 = arith.constant 0 : i32
    return %c0_i32, %c0_i32_0, %c0_i32_1 : i32, i32, i32
  }
  func.func @transform_6(%arg0: i32, %arg1: i32) -> (i32, i32) {
    %c0_i32 = arith.constant 0 : i32
    %c0_i32_0 = arith.constant 0 : i32
    %c0_i32_1 = arith.constant 0 : i32
    return %c0_i32, %c0_i32_0 : i32, i32
  }
  func.func @transform_7(%arg0: i32, %arg1: i32) -> (i32, i32) {
    %c0_i32 = arith.constant 0 : i32
    %c0_i32_0 = arith.constant 0 : i32
    %c0_i32_1 = arith.constant 0 : i32
    return %c0_i32, %c0_i32_0 : i32, i32
  }
  func.func @transform_8(%arg0: i32, %arg1: i32) -> (i32, i32) {
    %c0_i32 = arith.constant 0 : i32
    %c0_i32_0 = arith.constant 0 : i32
    %c0_i32_1 = arith.constant 0 : i32
    return %c0_i32, %c0_i32_0 : i32, i32
  }
  func.func @transform_9(%arg0: i32, %arg1: i32) -> (i32, i32) {
    %c0_i32 = arith.constant 0 : i32
    %c0_i32_0 = arith.constant 0 : i32
    %c0_i32_1 = arith.constant 0 : i32
    return %c0_i32, %c0_i32_0 : i32, i32
  }
  func.func @transform_10(%arg0: i32, %arg1: i32) -> (i32, i32) {
    %c0_i32 = arith.constant 0 : i32
    %c0_i32_0 = arith.constant 0 : i32
    %c0_i32_1 = arith.constant 0 : i32
    return %c0_i32, %c0_i32_0 : i32, i32
  }
  func.func @transform_11(%arg0: i32, %arg1: i32) -> (i32, i32, i32) {
    %c0_i32 = arith.constant 0 : i32
    %c0_i32_0 = arith.constant 0 : i32
    return %arg0, %arg1, %c0_i32 : i32, i32, i32
  }
}

module attributes {stable_mosaic.version = 11 : i64} {
  func.func @encoder_kernel(%arg0: i32, %arg1: i32, %arg2: memref<1x8x32xf32, #tpu.memory_space<vmem>>, %arg3: memref<1x32xf32, #tpu.memory_space<vmem>>, %arg4: memref<1x32xf32, #tpu.memory_space<vmem>>, %arg5: memref<32x96xf32, #tpu.memory_space<vmem>>, %arg6: memref<1x96xf32, #tpu.memory_space<vmem>>, %arg7: memref<4x8x32xf32, #tpu.memory_space<vmem>>, %arg8: memref<1x32xf32, #tpu.memory_space<vmem>>, %arg9: memref<32x32xf32, #tpu.memory_space<vmem>>, %arg10: memref<1x32xf32, #tpu.memory_space<vmem>>, %arg11: memref<32x32xf32, #tpu.memory_space<vmem>>, %arg12: memref<1x32xf32, #tpu.memory_space<vmem>>, %arg13: memref<1x8x32xf32, #tpu.memory_space<vmem>>, %arg14: memref<4x8x8xf32, #tpu.memory_space<vmem>>, %arg15: memref<4x8x8xf32, #tpu.memory_space<vmem>>, %arg16: memref<4x8x8xf32, #tpu.memory_space<vmem>>) attributes {dimension_semantics = [#tpu.dimension_semantics<parallel>, #tpu.dimension_semantics<arbitrary>], iteration_bounds = array<i64: 2, 1>, scalar_prefetch = 0 : i64, scratch_operands = 3 : i64, tpu.core_type = #tpu.core_type<tc>, window_params = [{transform_indices = @transform_0, window_bounds = array<i64: 1, 8, 32>}, {pipeline_mode = #tpu.pipeline_mode<synchronous>, transform_indices = @transform_1, window_bounds = array<i64: 1, 32>}, {pipeline_mode = #tpu.pipeline_mode<synchronous>, transform_indices = @transform_2, window_bounds = array<i64: 1, 32>}, {pipeline_mode = #tpu.pipeline_mode<synchronous>, transform_indices = @transform_3, window_bounds = array<i64: 32, 96>}, {pipeline_mode = #tpu.pipeline_mode<synchronous>, transform_indices = @transform_4, window_bounds = array<i64: 1, 96>}, {pipeline_mode = #tpu.pipeline_mode<synchronous>, transform_indices = @transform_5, window_bounds = array<i64: 4, 8, 32>}, {pipeline_mode = #tpu.pipeline_mode<synchronous>, transform_indices = @transform_6, window_bounds = array<i64: 1, 32>}, {pipeline_mode = #tpu.pipeline_mode<synchronous>, transform_indices = @transform_7, window_bounds = array<i64: 32, 32>}, {pipeline_mode = #tpu.pipeline_mode<synchronous>, transform_indices = @transform_8, window_bounds = array<i64: 1, 32>}, {pipeline_mode = #tpu.pipeline_mode<synchronous>, transform_indices = @transform_9, window_bounds = array<i64: 32, 32>}, {pipeline_mode = #tpu.pipeline_mode<synchronous>, transform_indices = @transform_10, window_bounds = array<i64: 1, 32>}, {transform_indices = @transform_11, window_bounds = array<i64: 1, 8, 32>}]} {
    %c0 = arith.constant 0 : index
    %c0_0 = arith.constant 0 : index
    %0 = vector.load %arg3[%c0, %c0_0] : memref<1x32xf32, #tpu.memory_space<vmem>>, vector<1x32xf32>
    %c0_1 = arith.constant 0 : index
    %c0_2 = arith.constant 0 : index
    %1 = vector.load %arg4[%c0_1, %c0_2] : memref<1x32xf32, #tpu.memory_space<vmem>>, vector<1x32xf32>
    %c0_i32 = arith.constant 0 : i32
    %2 = arith.cmpi eq, %arg1, %c0_i32 : i32
    %3 = arith.extui %2 : i1 to i32
    %c0_i32_3 = arith.constant 0 : i32
    %4 = arith.cmpi ne, %3, %c0_i32_3 : i32
    scf.if %4 {
      %c0_44 = arith.constant 0 : index
      %c0_45 = arith.constant 0 : index
      %c0_46 = arith.constant 0 : index
      %87 = vector.load %arg2[%c0_44, %c0_45, %c0_46] : memref<1x8x32xf32, #tpu.memory_space<vmem>>, vector<1x8x32xf32>
      %88 = vector.shape_cast %87 : vector<1x8x32xf32> to vector<8x32xf32>
      %cst_47 = arith.constant dense<0.000000e+00> : vector<8xf32>
      %89 = vector.multi_reduction <add>, %88, %cst_47 [1] : vector<8x32xf32> to vector<8xf32>
      %90 = vector.shape_cast %89 : vector<8xf32> to vector<8x1xf32>
      %cst_48 = arith.constant 3.200000e+01 : f32
      %91 = vector.broadcast %cst_48 : f32 to vector<8x1xf32>
      %92 = arith.divf %90, %91 : vector<8x1xf32>
      %93 = vector.broadcast %92 : vector<8x1xf32> to vector<8x32xf32>
      %94 = arith.subf %88, %93 : vector<8x32xf32>
      %95 = arith.mulf %94, %94 : vector<8x32xf32>
      %cst_49 = arith.constant dense<0.000000e+00> : vector<8xf32>
      %96 = vector.multi_reduction <add>, %95, %cst_49 [1] : vector<8x32xf32> to vector<8xf32>
      %97 = vector.shape_cast %96 : vector<8xf32> to vector<8x1xf32>
      %cst_50 = arith.constant 3.200000e+01 : f32
      %98 = vector.broadcast %cst_50 : f32 to vector<8x1xf32>
      %99 = arith.divf %97, %98 : vector<8x1xf32>
      %100 = vector.broadcast %92 : vector<8x1xf32> to vector<8x32xf32>
      %101 = arith.subf %88, %100 : vector<8x32xf32>
      %cst_51 = arith.constant 9.99999974E-6 : f32
      %102 = vector.broadcast %cst_51 : f32 to vector<8x1xf32>
      %103 = arith.addf %99, %102 : vector<8x1xf32>
      %104 = math.rsqrt %103 : vector<8x1xf32>
      %105 = vector.broadcast %104 : vector<8x1xf32> to vector<8x32xf32>
      %106 = arith.mulf %101, %105 : vector<8x32xf32>
      %107 = vector.broadcast %0 : vector<1x32xf32> to vector<8x32xf32>
      %108 = arith.mulf %106, %107 : vector<8x32xf32>
      %109 = vector.broadcast %1 : vector<1x32xf32> to vector<8x32xf32>
      %110 = arith.addf %108, %109 : vector<8x32xf32>
      %c0_52 = arith.constant 0 : index
      %c0_53 = arith.constant 0 : index
      %111 = vector.load %arg5[%c0_52, %c0_53] : memref<32x96xf32, #tpu.memory_space<vmem>>, vector<32x96xf32>
      %cst_54 = arith.constant dense<0.000000e+00> : vector<8x96xf32>
      %112 = tpu.matmul %110, %111, %cst_54 {dimension_numbers = #tpu.dot_dimension_numbers<[1], [0], [0], [1], [0, 0, 1, 1], [], []>} : vector<8x32xf32>, vector<32x96xf32>, vector<8x96xf32> -> vector<8x96xf32>
      %c0_55 = arith.constant 0 : index
      %c0_56 = arith.constant 0 : index
      %113 = vector.load %arg6[%c0_55, %c0_56] : memref<1x96xf32, #tpu.memory_space<vmem>>, vector<1x96xf32>
      %114 = vector.broadcast %113 : vector<1x96xf32> to vector<8x96xf32>
      %115 = arith.addf %112, %114 : vector<8x96xf32>
      %116 = vector.extract_strided_slice %115 {offsets = [0, 0], sizes = [8, 32], strides = [1, 1]} : vector<8x96xf32> to vector<8x32xf32>
      %117 = vector.extract_strided_slice %115 {offsets = [0, 32], sizes = [8, 32], strides = [1, 1]} : vector<8x96xf32> to vector<8x32xf32>
      %118 = vector.extract_strided_slice %115 {offsets = [0, 64], sizes = [8, 32], strides = [1, 1]} : vector<8x96xf32> to vector<8x32xf32>
      %119 = vector.extract_strided_slice %116 {offsets = [0, 0], sizes = [8, 8], strides = [1, 1]} : vector<8x32xf32> to vector<8x8xf32>
      %c0_57 = arith.constant 0 : index
      %c0_58 = arith.constant 0 : index
      %c0_59 = arith.constant 0 : index
      %120 = vector.load %arg14[%c0_57, %c0_58, %c0_59] : memref<4x8x8xf32, #tpu.memory_space<vmem>>, vector<1x8x8xf32>
      %121 = vector.shape_cast %120 : vector<1x8x8xf32> to vector<8x8xf32>
      %122 = vector.shape_cast %119 : vector<8x8xf32> to vector<1x8x8xf32>
      tpu.vector_store %arg14[%c0_57, %c0_58, %c0_59], %122 {strides = array<i32>} : memref<4x8x8xf32, #tpu.memory_space<vmem>>, vector<1x8x8xf32>,
      %123 = vector.extract_strided_slice %117 {offsets = [0, 0], sizes = [8, 8], strides = [1, 1]} : vector<8x32xf32> to vector<8x8xf32>
      %c0_60 = arith.constant 0 : index
      %c0_61 = arith.constant 0 : index
      %c0_62 = arith.constant 0 : index
      %124 = vector.load %arg15[%c0_60, %c0_61, %c0_62] : memref<4x8x8xf32, #tpu.memory_space<vmem>>, vector<1x8x8xf32>
      %125 = vector.shape_cast %124 : vector<1x8x8xf32> to vector<8x8xf32>
      %126 = vector.shape_cast %123 : vector<8x8xf32> to vector<1x8x8xf32>
      tpu.vector_store %arg15[%c0_60, %c0_61, %c0_62], %126 {strides = array<i32>} : memref<4x8x8xf32, #tpu.memory_space<vmem>>, vector<1x8x8xf32>,
      %127 = vector.extract_strided_slice %118 {offsets = [0, 0], sizes = [8, 8], strides = [1, 1]} : vector<8x32xf32> to vector<8x8xf32>
      %c0_63 = arith.constant 0 : index
      %c0_64 = arith.constant 0 : index
      %c0_65 = arith.constant 0 : index
      %128 = vector.load %arg16[%c0_63, %c0_64, %c0_65] : memref<4x8x8xf32, #tpu.memory_space<vmem>>, vector<1x8x8xf32>
      %129 = vector.shape_cast %128 : vector<1x8x8xf32> to vector<8x8xf32>
      %130 = vector.shape_cast %127 : vector<8x8xf32> to vector<1x8x8xf32>
      tpu.vector_store %arg16[%c0_63, %c0_64, %c0_65], %130 {strides = array<i32>} : memref<4x8x8xf32, #tpu.memory_space<vmem>>, vector<1x8x8xf32>,
      %131 = vector.extract_strided_slice %116 {offsets = [0, 8], sizes = [8, 8], strides = [1, 1]} : vector<8x32xf32> to vector<8x8xf32>
      %c1 = arith.constant 1 : index
      %c0_66 = arith.constant 0 : index
      %c0_67 = arith.constant 0 : index
      %132 = vector.load %arg14[%c1, %c0_66, %c0_67] : memref<4x8x8xf32, #tpu.memory_space<vmem>>, vector<1x8x8xf32>
      %133 = vector.shape_cast %132 : vector<1x8x8xf32> to vector<8x8xf32>
      %134 = vector.shape_cast %131 : vector<8x8xf32> to vector<1x8x8xf32>
      tpu.vector_store %arg14[%c1, %c0_66, %c0_67], %134 {strides = array<i32>} : memref<4x8x8xf32, #tpu.memory_space<vmem>>, vector<1x8x8xf32>,
      %135 = vector.extract_strided_slice %117 {offsets = [0, 8], sizes = [8, 8], strides = [1, 1]} : vector<8x32xf32> to vector<8x8xf32>
      %c1_68 = arith.constant 1 : index
      %c0_69 = arith.constant 0 : index
      %c0_70 = arith.constant 0 : index
      %136 = vector.load %arg15[%c1_68, %c0_69, %c0_70] : memref<4x8x8xf32, #tpu.memory_space<vmem>>, vector<1x8x8xf32>
      %137 = vector.shape_cast %136 : vector<1x8x8xf32> to vector<8x8xf32>
      %138 = vector.shape_cast %135 : vector<8x8xf32> to vector<1x8x8xf32>
      tpu.vector_store %arg15[%c1_68, %c0_69, %c0_70], %138 {strides = array<i32>} : memref<4x8x8xf32, #tpu.memory_space<vmem>>, vector<1x8x8xf32>,
      %139 = vector.extract_strided_slice %118 {offsets = [0, 8], sizes = [8, 8], strides = [1, 1]} : vector<8x32xf32> to vector<8x8xf32>
      %c1_71 = arith.constant 1 : index
      %c0_72 = arith.constant 0 : index
      %c0_73 = arith.constant 0 : index
      %140 = vector.load %arg16[%c1_71, %c0_72, %c0_73] : memref<4x8x8xf32, #tpu.memory_space<vmem>>, vector<1x8x8xf32>
      %141 = vector.shape_cast %140 : vector<1x8x8xf32> to vector<8x8xf32>
      %142 = vector.shape_cast %139 : vector<8x8xf32> to vector<1x8x8xf32>
      tpu.vector_store %arg16[%c1_71, %c0_72, %c0_73], %142 {strides = array<i32>} : memref<4x8x8xf32, #tpu.memory_space<vmem>>, vector<1x8x8xf32>,
      %143 = vector.extract_strided_slice %116 {offsets = [0, 16], sizes = [8, 8], strides = [1, 1]} : vector<8x32xf32> to vector<8x8xf32>
      %c2 = arith.constant 2 : index
      %c0_74 = arith.constant 0 : index
      %c0_75 = arith.constant 0 : index
      %144 = vector.load %arg14[%c2, %c0_74, %c0_75] : memref<4x8x8xf32, #tpu.memory_space<vmem>>, vector<1x8x8xf32>
      %145 = vector.shape_cast %144 : vector<1x8x8xf32> to vector<8x8xf32>
      %146 = vector.shape_cast %143 : vector<8x8xf32> to vector<1x8x8xf32>
      tpu.vector_store %arg14[%c2, %c0_74, %c0_75], %146 {strides = array<i32>} : memref<4x8x8xf32, #tpu.memory_space<vmem>>, vector<1x8x8xf32>,
      %147 = vector.extract_strided_slice %117 {offsets = [0, 16], sizes = [8, 8], strides = [1, 1]} : vector<8x32xf32> to vector<8x8xf32>
      %c2_76 = arith.constant 2 : index
      %c0_77 = arith.constant 0 : index
      %c0_78 = arith.constant 0 : index
      %148 = vector.load %arg15[%c2_76, %c0_77, %c0_78] : memref<4x8x8xf32, #tpu.memory_space<vmem>>, vector<1x8x8xf32>
      %149 = vector.shape_cast %148 : vector<1x8x8xf32> to vector<8x8xf32>
      %150 = vector.shape_cast %147 : vector<8x8xf32> to vector<1x8x8xf32>
      tpu.vector_store %arg15[%c2_76, %c0_77, %c0_78], %150 {strides = array<i32>} : memref<4x8x8xf32, #tpu.memory_space<vmem>>, vector<1x8x8xf32>,
      %151 = vector.extract_strided_slice %118 {offsets = [0, 16], sizes = [8, 8], strides = [1, 1]} : vector<8x32xf32> to vector<8x8xf32>
      %c2_79 = arith.constant 2 : index
      %c0_80 = arith.constant 0 : index
      %c0_81 = arith.constant 0 : index
      %152 = vector.load %arg16[%c2_79, %c0_80, %c0_81] : memref<4x8x8xf32, #tpu.memory_space<vmem>>, vector<1x8x8xf32>
      %153 = vector.shape_cast %152 : vector<1x8x8xf32> to vector<8x8xf32>
      %154 = vector.shape_cast %151 : vector<8x8xf32> to vector<1x8x8xf32>
      tpu.vector_store %arg16[%c2_79, %c0_80, %c0_81], %154 {strides = array<i32>} : memref<4x8x8xf32, #tpu.memory_space<vmem>>, vector<1x8x8xf32>,
      %155 = vector.extract_strided_slice %116 {offsets = [0, 24], sizes = [8, 8], strides = [1, 1]} : vector<8x32xf32> to vector<8x8xf32>
      %c3 = arith.constant 3 : index
      %c0_82 = arith.constant 0 : index
      %c0_83 = arith.constant 0 : index
      %156 = vector.load %arg14[%c3, %c0_82, %c0_83] : memref<4x8x8xf32, #tpu.memory_space<vmem>>, vector<1x8x8xf32>
      %157 = vector.shape_cast %156 : vector<1x8x8xf32> to vector<8x8xf32>
      %158 = vector.shape_cast %155 : vector<8x8xf32> to vector<1x8x8xf32>
      tpu.vector_store %arg14[%c3, %c0_82, %c0_83], %158 {strides = array<i32>} : memref<4x8x8xf32, #tpu.memory_space<vmem>>, vector<1x8x8xf32>,
      %159 = vector.extract_strided_slice %117 {offsets = [0, 24], sizes = [8, 8], strides = [1, 1]} : vector<8x32xf32> to vector<8x8xf32>
      %c3_84 = arith.constant 3 : index
      %c0_85 = arith.constant 0 : index
      %c0_86 = arith.constant 0 : index
      %160 = vector.load %arg15[%c3_84, %c0_85, %c0_86] : memref<4x8x8xf32, #tpu.memory_space<vmem>>, vector<1x8x8xf32>
      %161 = vector.shape_cast %160 : vector<1x8x8xf32> to vector<8x8xf32>
      %162 = vector.shape_cast %159 : vector<8x8xf32> to vector<1x8x8xf32>
      tpu.vector_store %arg15[%c3_84, %c0_85, %c0_86], %162 {strides = array<i32>} : memref<4x8x8xf32, #tpu.memory_space<vmem>>, vector<1x8x8xf32>,
      %163 = vector.extract_strided_slice %118 {offsets = [0, 24], sizes = [8, 8], strides = [1, 1]} : vector<8x32xf32> to vector<8x8xf32>
      %c3_87 = arith.constant 3 : index
      %c0_88 = arith.constant 0 : index
      %c0_89 = arith.constant 0 : index
      %164 = vector.load %arg16[%c3_87, %c0_88, %c0_89] : memref<4x8x8xf32, #tpu.memory_space<vmem>>, vector<1x8x8xf32>
      %165 = vector.shape_cast %164 : vector<1x8x8xf32> to vector<8x8xf32>
      %166 = vector.shape_cast %163 : vector<8x8xf32> to vector<1x8x8xf32>
      tpu.vector_store %arg16[%c3_87, %c0_88, %c0_89], %166 {strides = array<i32>} : memref<4x8x8xf32, #tpu.memory_space<vmem>>, vector<1x8x8xf32>,
    } else {
    }
    %c8_i32 = arith.constant 8 : i32
    %5 = arith.muli %arg1, %c8_i32 : i32
    %6 = tpu.assume_multiple %5, 8 : i32
    %c0_4 = arith.constant 0 : index
    %7 = arith.index_cast %6 : i32 to index
    %c0_5 = arith.constant 0 : index
    %8 = vector.load %arg2[%c0_4, %7, %c0_5] : memref<1x8x32xf32, #tpu.memory_space<vmem>>, vector<1x8x32xf32>
    %9 = vector.shape_cast %8 : vector<1x8x32xf32> to vector<8x32xf32>
    %c0_6 = arith.constant 0 : index
    %10 = arith.index_cast %6 : i32 to index
    %c0_7 = arith.constant 0 : index
    %11 = vector.load %arg14[%c0_6, %10, %c0_7] : memref<4x8x8xf32, #tpu.memory_space<vmem>>, vector<4x8x8xf32>
    %c0_8 = arith.constant 0 : index
    %c0_9 = arith.constant 0 : index
    %c0_10 = arith.constant 0 : index
    %12 = vector.load %arg15[%c0_8, %c0_9, %c0_10] : memref<4x8x8xf32, #tpu.memory_space<vmem>>, vector<4x8x8xf32>
    "tpu.trace_start"() <{level = 10 : i32, message = "hqd,hkd->hqk"}> : () -> ()
    %cst = arith.constant dense<0.000000e+00> : vector<4x8x8xf32>
    %13 = tpu.matmul %11, %12, %cst {dimension_numbers = #tpu.dot_dimension_numbers<[2], [2], [1], [1], [0, 0, 0, 1, 1, 1], [0], [0]>} : vector<4x8x8xf32>, vector<4x8x8xf32>, vector<4x8x8xf32> -> vector<4x8x8xf32>
    "tpu.trace_stop"() : () -> ()
    %cst_11 = arith.constant dense<0xFF800000> : vector<4x8xf32>
    %14 = vector.multi_reduction <maximumf>, %13, %cst_11 [2] : vector<4x8x8xf32> to vector<4x8xf32>
    %15 = vector.shape_cast %14 : vector<4x8xf32> to vector<4x8x1xf32>
    %16 = vector.broadcast %15 : vector<4x8x1xf32> to vector<4x8x8xf32>
    %17 = arith.subf %13, %16 : vector<4x8x8xf32>
    %18 = math.exp %17 : vector<4x8x8xf32>
    %cst_12 = arith.constant dense<0.000000e+00> : vector<4x8xf32>
    %19 = vector.multi_reduction <add>, %18, %cst_12 [2] : vector<4x8x8xf32> to vector<4x8xf32>
    %20 = vector.shape_cast %19 : vector<4x8xf32> to vector<4x8x1xf32>
    %21 = tpu.reciprocal %20 : vector<4x8x1xf32> -> vector<4x8x1xf32>
    %22 = vector.broadcast %21 : vector<4x8x1xf32> to vector<4x8x8xf32>
    %23 = arith.mulf %18, %22 : vector<4x8x8xf32>
    %c0_13 = arith.constant 0 : index
    %c0_14 = arith.constant 0 : index
    %c0_15 = arith.constant 0 : index
    %24 = vector.load %arg16[%c0_13, %c0_14, %c0_15] : memref<4x8x8xf32, #tpu.memory_space<vmem>>, vector<4x8x8xf32>
    "tpu.trace_start"() <{level = 10 : i32, message = "hqk,hkd->hqd"}> : () -> ()
    %cst_16 = arith.constant dense<0.000000e+00> : vector<4x8x8xf32>
    %25 = tpu.matmul %23, %24, %cst_16 {dimension_numbers = #tpu.dot_dimension_numbers<[2], [1], [1], [2], [0, 0, 0, 1, 1, 2], [0], [0]>} : vector<4x8x8xf32>, vector<4x8x8xf32>, vector<4x8x8xf32> -> vector<4x8x8xf32>
    "tpu.trace_stop"() : () -> ()
    %c0_17 = arith.constant 0 : index
    %c0_18 = arith.constant 0 : index
    %c0_19 = arith.constant 0 : index
    %26 = vector.load %arg7[%c0_17, %c0_18, %c0_19] : memref<4x8x32xf32, #tpu.memory_space<vmem>>, vector<4x8x32xf32>
    "tpu.trace_start"() <{level = 10 : i32, message = "hqd,hdn->hqn"}> : () -> ()
    %cst_20 = arith.constant dense<0.000000e+00> : vector<4x8x32xf32>
    %27 = tpu.matmul %25, %26, %cst_20 {dimension_numbers = #tpu.dot_dimension_numbers<[2], [1], [1], [2], [0, 0, 0, 1, 1, 2], [0], [0]>} : vector<4x8x8xf32>, vector<4x8x32xf32>, vector<4x8x32xf32> -> vector<4x8x32xf32>
    "tpu.trace_stop"() : () -> ()
    %c0_21 = arith.constant 0 : index
    %c0_22 = arith.constant 0 : index
    %28 = vector.load %arg8[%c0_21, %c0_22] : memref<1x32xf32, #tpu.memory_space<vmem>>, vector<1x32xf32>
    %29 = vector.extract_strided_slice %27 {offsets = [0, 0, 0], sizes = [1, 8, 32], strides = [1, 1, 1]} : vector<4x8x32xf32> to vector<1x8x32xf32>
    %30 = vector.shape_cast %29 : vector<1x8x32xf32> to vector<8x32xf32>
    %31 = vector.broadcast %28 : vector<1x32xf32> to vector<8x32xf32>
    %32 = arith.addf %31, %30 : vector<8x32xf32>
    %33 = vector.extract_strided_slice %27 {offsets = [1, 0, 0], sizes = [1, 8, 32], strides = [1, 1, 1]} : vector<4x8x32xf32> to vector<1x8x32xf32>
    %34 = vector.shape_cast %33 : vector<1x8x32xf32> to vector<8x32xf32>
    %35 = arith.addf %32, %34 : vector<8x32xf32>
    %36 = vector.extract_strided_slice %27 {offsets = [2, 0, 0], sizes = [1, 8, 32], strides = [1, 1, 1]} : vector<4x8x32xf32> to vector<1x8x32xf32>
    %37 = vector.shape_cast %36 : vector<1x8x32xf32> to vector<8x32xf32>
    %38 = arith.addf %35, %37 : vector<8x32xf32>
    %39 = vector.extract_strided_slice %27 {offsets = [3, 0, 0], sizes = [1, 8, 32], strides = [1, 1, 1]} : vector<4x8x32xf32> to vector<1x8x32xf32>
    %40 = vector.shape_cast %39 : vector<1x8x32xf32> to vector<8x32xf32>
    %41 = arith.addf %38, %40 : vector<8x32xf32>
    %42 = arith.addf %9, %41 : vector<8x32xf32>
    %cst_23 = arith.constant dense<0.000000e+00> : vector<8xf32>
    %43 = vector.multi_reduction <add>, %42, %cst_23 [1] : vector<8x32xf32> to vector<8xf32>
    %44 = vector.shape_cast %43 : vector<8xf32> to vector<8x1xf32>
    %cst_24 = arith.constant 3.200000e+01 : f32
    %45 = vector.broadcast %cst_24 : f32 to vector<8x1xf32>
    %46 = arith.divf %44, %45 : vector<8x1xf32>
    %47 = vector.broadcast %46 : vector<8x1xf32> to vector<8x32xf32>
    %48 = arith.subf %42, %47 : vector<8x32xf32>
    %49 = arith.mulf %48, %48 : vector<8x32xf32>
    %cst_25 = arith.constant dense<0.000000e+00> : vector<8xf32>
    %50 = vector.multi_reduction <add>, %49, %cst_25 [1] : vector<8x32xf32> to vector<8xf32>
    %51 = vector.shape_cast %50 : vector<8xf32> to vector<8x1xf32>
    %cst_26 = arith.constant 3.200000e+01 : f32
    %52 = vector.broadcast %cst_26 : f32 to vector<8x1xf32>
    %53 = arith.divf %51, %52 : vector<8x1xf32>
    %54 = vector.broadcast %46 : vector<8x1xf32> to vector<8x32xf32>
    %55 = arith.subf %42, %54 : vector<8x32xf32>
    %cst_27 = arith.constant 9.99999974E-6 : f32
    %56 = vector.broadcast %cst_27 : f32 to vector<8x1xf32>
    %57 = arith.addf %53, %56 : vector<8x1xf32>
    %58 = math.rsqrt %57 : vector<8x1xf32>
    %59 = vector.broadcast %58 : vector<8x1xf32> to vector<8x32xf32>
    %60 = arith.mulf %55, %59 : vector<8x32xf32>
    %61 = vector.broadcast %0 : vector<1x32xf32> to vector<8x32xf32>
    %62 = arith.mulf %60, %61 : vector<8x32xf32>
    %63 = vector.broadcast %1 : vector<1x32xf32> to vector<8x32xf32>
    %64 = arith.addf %62, %63 : vector<8x32xf32>
    %c0_28 = arith.constant 0 : index
    %c0_29 = arith.constant 0 : index
    %65 = vector.load %arg9[%c0_28, %c0_29] : memref<32x32xf32, #tpu.memory_space<vmem>>, vector<32x32xf32>
    %cst_30 = arith.constant dense<0.000000e+00> : vector<8x32xf32>
    %66 = tpu.matmul %64, %65, %cst_30 {dimension_numbers = #tpu.dot_dimension_numbers<[1], [0], [0], [1], [0, 0, 1, 1], [], []>} : vector<8x32xf32>, vector<32x32xf32>, vector<8x32xf32> -> vector<8x32xf32>
    %c0_31 = arith.constant 0 : index
    %c0_32 = arith.constant 0 : index
    %67 = vector.load %arg10[%c0_31, %c0_32] : memref<1x32xf32, #tpu.memory_space<vmem>>, vector<1x32xf32>
    %68 = vector.broadcast %67 : vector<1x32xf32> to vector<8x32xf32>
    %69 = arith.addf %66, %68 : vector<8x32xf32>
    %cst_33 = arith.constant 5.000000e-01 : f32
    %70 = vector.broadcast %cst_33 : f32 to vector<8x32xf32>
    %71 = arith.mulf %70, %69 : vector<8x32xf32>
    %cst_34 = arith.constant 0.707106769 : f32
    %72 = vector.broadcast %cst_34 : f32 to vector<8x32xf32>
    %73 = arith.mulf %69, %72 : vector<8x32xf32>
    %74 = math.erf %73 : vector<8x32xf32>
    %cst_35 = arith.constant 1.000000e+00 : f32
    %75 = vector.broadcast %cst_35 : f32 to vector<8x32xf32>
    %76 = arith.addf %75, %74 : vector<8x32xf32>
    %77 = arith.mulf %71, %76 : vector<8x32xf32>
    %c0_36 = arith.constant 0 : index
    %c0_37 = arith.constant 0 : index
    %78 = vector.load %arg11[%c0_36, %c0_37] : memref<32x32xf32, #tpu.memory_space<vmem>>, vector<32x32xf32>
    %cst_38 = arith.constant dense<0.000000e+00> : vector<8x32xf32>
    %79 = tpu.matmul %77, %78, %cst_38 {dimension_numbers = #tpu.dot_dimension_numbers<[1], [0], [0], [1], [0, 0, 1, 1], [], []>} : vector<8x32xf32>, vector<32x32xf32>, vector<8x32xf32> -> vector<8x32xf32>
    %c0_39 = arith.constant 0 : index
    %c0_40 = arith.constant 0 : index
    %80 = vector.load %arg12[%c0_39, %c0_40] : memref<1x32xf32, #tpu.memory_space<vmem>>, vector<1x32xf32>
    %81 = vector.broadcast %80 : vector<1x32xf32> to vector<8x32xf32>
    %82 = arith.addf %79, %81 : vector<8x32xf32>
    %83 = arith.addf %42, %82 : vector<8x32xf32>
    %c0_41 = arith.constant 0 : index
    %c0_42 = arith.constant 0 : index
    %c0_43 = arith.constant 0 : index
    %84 = vector.load %arg13[%c0_41, %c0_42, %c0_43] : memref<1x8x32xf32, #tpu.memory_space<vmem>>, vector<1x8x32xf32>
    %85 = vector.shape_cast %84 : vector<1x8x32xf32> to vector<8x32xf32>
    %86 = vector.shape_cast %83 : vector<8x32xf32> to vector<1x8x32xf32>
    tpu.vector_store %arg13[%c0_41, %c0_42, %c0_43], %86 {strides = array<i32>} : memref<1x8x32xf32, #tpu.memory_space<vmem>>, vector<1x8x32xf32>,
    return
  }
  func.func @transform_0(%arg0: i32, %arg1: i32) -> (i32, i32, i32) {
    %c0_i32 = arith.constant 0 : i32
    %c0_i32_0 = arith.constant 0 : i32
    %c0_i32_1 = arith.constant 0 : i32
    return %arg0, %c0_i32, %c0_i32_0 : i32, i32, i32
  }
  func.func @transform_1(%arg0: i32, %arg1: i32) -> (i32, i32) {
    %c0_i32 = arith.constant 0 : i32
    %c0_i32_0 = arith.constant 0 : i32
    %c0_i32_1 = arith.constant 0 : i32
    return %c0_i32, %c0_i32_0 : i32, i32
  }
  func.func @transform_2(%arg0: i32, %arg1: i32) -> (i32, i32) {
    %c0_i32 = arith.constant 0 : i32
    %c0_i32_0 = arith.constant 0 : i32
    %c0_i32_1 = arith.constant 0 : i32
    return %c0_i32, %c0_i32_0 : i32, i32
  }
  func.func @transform_3(%arg0: i32, %arg1: i32) -> (i32, i32) {
    %c0_i32 = arith.constant 0 : i32
    %c0_i32_0 = arith.constant 0 : i32
    %c0_i32_1 = arith.constant 0 : i32
    return %c0_i32, %c0_i32_0 : i32, i32
  }
  func.func @transform_4(%arg0: i32, %arg1: i32) -> (i32, i32) {
    %c0_i32 = arith.constant 0 : i32
    %c0_i32_0 = arith.constant 0 : i32
    %c0_i32_1 = arith.constant 0 : i32
    return %c0_i32, %c0_i32_0 : i32, i32
  }
  func.func @transform_5(%arg0: i32, %arg1: i32) -> (i32, i32, i32) {
    %c0_i32 = arith.constant 0 : i32
    %c0_i32_0 = arith.constant 0 : i32
    %c0_i32_1 = arith.constant 0 : i32
    %c0_i32_2 = arith.constant 0 : i32
    return %c0_i32, %c0_i32_0, %c0_i32_1 : i32, i32, i32
  }
  func.func @transform_6(%arg0: i32, %arg1: i32) -> (i32, i32) {
    %c0_i32 = arith.constant 0 : i32
    %c0_i32_0 = arith.constant 0 : i32
    %c0_i32_1 = arith.constant 0 : i32
    return %c0_i32, %c0_i32_0 : i32, i32
  }
  func.func @transform_7(%arg0: i32, %arg1: i32) -> (i32, i32) {
    %c0_i32 = arith.constant 0 : i32
    %c0_i32_0 = arith.constant 0 : i32
    %c0_i32_1 = arith.constant 0 : i32
    return %c0_i32, %c0_i32_0 : i32, i32
  }
  func.func @transform_8(%arg0: i32, %arg1: i32) -> (i32, i32) {
    %c0_i32 = arith.constant 0 : i32
    %c0_i32_0 = arith.constant 0 : i32
    %c0_i32_1 = arith.constant 0 : i32
    return %c0_i32, %c0_i32_0 : i32, i32
  }
  func.func @transform_9(%arg0: i32, %arg1: i32) -> (i32, i32) {
    %c0_i32 = arith.constant 0 : i32
    %c0_i32_0 = arith.constant 0 : i32
    %c0_i32_1 = arith.constant 0 : i32
    return %c0_i32, %c0_i32_0 : i32, i32
  }
  func.func @transform_10(%arg0: i32, %arg1: i32) -> (i32, i32) {
    %c0_i32 = arith.constant 0 : i32
    %c0_i32_0 = arith.constant 0 : i32
    %c0_i32_1 = arith.constant 0 : i32
    return %c0_i32, %c0_i32_0 : i32, i32
  }
  func.func @transform_11(%arg0: i32, %arg1: i32) -> (i32, i32, i32) {
    %c0_i32 = arith.constant 0 : i32
    %c0_i32_0 = arith.constant 0 : i32
    return %arg0, %arg1, %c0_i32 : i32, i32, i32
  }
}

</mosaic_0001>

<bundles_post_ra>
// kernel: tpu_custom_call.1
= control target key start
LH: loop header
LB: loop body
LE: loop exit
PB: predicated region body
PF: predicated region fallthrough
CT: control target
= control target key end

     0   :  { %s2898_s0 = inlined_call_operand.hbm [shape: f32[2,8,32], index: 0, kind: input, shape index: {}]   ;;  %s2899_s1 = inlined_call_operand.vmem [shape: f32[1,32], index: 1, kind: input, shape index: {}]   ;;  %s2900_s2 = inlined_call_operand.vmem [shape: f32[1,32], index: 2, kind: input, shape index: {}]   ;;  %s2901_s3 = inlined_call_operand.hbm [shape: f32[32,96], index: 3, kind: input, shape index: {}]   ;;  %s2902_s4 = inlined_call_operand.vmem [shape: f32[1,96], index: 4, kind: input, shape index: {}]   ;;  %s2903_s5 = inlined_call_operand.hbm [shape: f32[4,8,32], index: 5, kind: input, shape index: {}]   ;;  %s2904_s6 = inlined_call_operand.vmem [shape: f32[1,32], index: 6, kind: input, shape index: {}]   ;;  %s2905_s7 = inlined_call_operand.hbm [shape: f32[32,32], index: 7, kind: input, shape index: {}]   ;;  %s2906_s8 = inlined_call_operand.vmem [shape: f32[1,32], index: 8, kind: input, shape index: {}]   ;;  %s2907_s9 = inlined_call_operand.hbm [shape: f32[32,32], index: 9, kind: input, shape index: {}]   ;;  %s2908_s10 = inlined_call_operand.vmem [shape: f32[1,32], index: 10, kind: input, shape index: {}]   ;;  %s2909_s11 = inlined_call_operand.hbm [shape: f32[2,8,32], index: 11, kind: output, shape index: {}]  }
   0x1   :  { %2927 = sst [smem:[#allocation22_spill]] %s2901_s3 }
   0x2   :  { %2928 = sst [smem:[#allocation23_spill]] %s2905_s7 }
   0x3   :  { %16 = vsyncpa [#allocation6], 0 }
   0x4   :  { %17 = vsyncpa [#allocation9], 0 }
   0x5   :  { %18 = vsyncpa [#allocation12], 0 }
   0x6   :  { %19 = vsyncpa [#allocation7], 0 }
   0x7   :  { %21 = vsyncpa [#allocation7 + $0x1], 0  ;;  %s2546_s17 = smov 0   ;;  %s2548_s18 = smov 0  }
   0x8   :  { %s2550_s19 = smov 0   ;;  %s2552_s20 = smov 0  }
   0x9   :  { %s2554_s21 = smov 0   ;;  %s2556_s22 = smov 0  }
   0xa LB: > { %2929 = sst [smem:[#allocation19_spill]] %s2443_s17  ;;  %s2465_s23 = smov [#allocation8]   ;;  %s2463_s22 = sphi %s2556_s22, %s27_s22   ;;  %s2459_s21 = sphi %s2554_s21, %s2954_s21   ;;  %s2455_s20 = sphi %s2552_s20, %s2953_s20   ;;  %s2451_s19 = sphi %s2550_s19, %s2957_s19   ;;  %s2447_s18 = sphi %s2548_s18, %s2956_s18   ;;  %s2443_s17 = sphi %s2546_s17, %s2955_s17  }
   0xb   : > { %2930 = sst [smem:[#allocation20_spill]] %s2459_s21  ;;  %s339_s24 = sshll.u32 %s2465_s23, 4  ;;  %s340_s24 = int_to_ptr.vmem [resolvable:$true] %s339_s24 }
   0xc   : > { %s1929_s25 = sadd.s32 4294967295, %s2463_s22   ;;  %p1931_p0 = scmp.ge.s32.totalorder %s2463_s22, 1 }
   0xd   : > { %p2580_p1 = scmp.eq.s32.totalorder %s1929_s25, 0  ;;  %p308_p2 = scmp.lt.s32.totalorder %s2463_s22, 3 }
   0xe   : > { %s2466_s28 = smov [#allocation11]   ;;  %s2254_s12 = scalar_lea.vmem %s340_s24, 512 }
   0xf   : > { %s2931_s26 = scalar_select %p2580_p1, 1, 0 }
  0x10   : > { %p2585_p3 = pnand %p1931_p0, %p308_p2  ;;  %s371_s29 = sshll.u32 %s2466_s28, 4  ;;  %s372_s29 = int_to_ptr.vmem [resolvable:$true] %s371_s29 }
  0x11   : > { %p2255_p7 = scmp.ne.s32.totalorder %s340_s24, %s2254_s12  ;;  %p2262_p10 = scmp.lt.s32.totalorder %s340_s24, %s340_s24 }
  0x12   : > { %s2932_s27 = scalar_select %p2585_p3, 1, 0 }
  0x13   : > { %p2124_p4 = pneg %p2585_p3  ;;  %p2263_p11 = scmp.lt.s32.totalorder %s2254_s12, %s2254_s12 }
  0x15   : > { %p2596_p5 = pnand %p2124_p4, %p2580_p1  ;;  %p2264_p12 = por %p2263_p11, %p2262_p10 }
  0x17   : > { %s2933_s30 = scalar_select %p2596_p5, 1, 0 }
  0x18   : > { %p2918_p6 = pneg %p2596_p5 }
  0x1a   : > { %p2257_p8 = pnand %p2255_p7, %p2918_p6 }
  0x1c   : > { %p2258_p9 = pneg %p2257_p8 }
  0x1e   : > { %p2265_p13 = pnand %p2264_p12, %p2258_p9 }
  0x20   : > { %2268 = shalt.err (!%p2265_p13)
}
  0x21   : > { %s2910_s13 = smov 128   ;;  %s2912_s14 = smov 8  }
  0x22   : > { %s2934_s3 = sld [smem:[#allocation22_spill]]  ;;  %s2280_s23 = scalar_lea.vmem %s372_s29, 512 }
  0x23   : > { %p2281_p0 = scmp.ne.s32.totalorder %s372_s29, %s2280_s23  ;;  %p2288_p8 = scmp.lt.s32.totalorder %s372_s29, %s372_s29 }
  0x24   : > { %p2289_p9 = scmp.lt.s32.totalorder %s2280_s23, %s2280_s23 }
  0x25   : > { %p2283_p2 = pnand %p2281_p0, %p2918_p6 }
  0x26   : > { %p2290_p10 = por %p2289_p9, %p2288_p8 }
  0x27   : > { %p2284_p7 = pneg %p2283_p2 }
  0x28   : > { %2130 = dma.hbm_to_vmem [thread:$0]  (!%p2596_p5), %s2934_s3, 512, %s340_s24, [#allocation9], %s2910_s13, %s2910_s13, %s2912_s14  }
  0x29   : > { %p2291_p11 = pnand %p2290_p10, %p2284_p7 }
  0x2b   : > { %2294 = shalt.err (!%p2291_p11)
}
  0x2c   : > { %s2935_s7 = sld [smem:[#allocation23_spill]]  ;;  %s1930_s24 = sadd.s32 4294967294, %s2463_s22  }
  0x2d   : > { %s39_s15 = sadd.s32 1, %s2459_s21  ;;  %s46_s16 = sadd.s32 1, %s2451_s19 }
  0x2e   : > { %p41_p12 = scmp.ge.s32.totalorder %s39_s15, 2  ;;  %p59_p13 = scmp.ne.s32.totalorder %s2447_s18, %s2443_s17 }
  0x2f   : > { %p294_p0 = scmp.ne.s32.totalorder %s2451_s19, %s2447_s18  ;;  %p295_p2 = scmp.eq.s32.totalorder %s1929_s25, 1 }
  0x30   : > { %s2959_s15 = smov (%p41_p12, %s39_s15), 0  ;;  %p2637_p7 = por %p2580_p1, %p59_p13 }
  0x31   : > { %2936 = sst [smem:[#allocation21_spill]] %s2959_s15  ;;  %p2641_p8 = por %p295_p2, %p294_p0 }
  0x32   : > { %2136 = dma.hbm_to_vmem [thread:$0]  (!%p2596_p5), %s2935_s7, 512, %s372_s29, [#allocation12], %s2910_s13, %s2910_s13, %s2912_s14  }
  0x33   : > { %s2937_s23 = scalar_select %p2637_p7, 1, 0 }
  0x34   : > { %s2938_s29 = scalar_select %p2641_p8, 1, 0 }
  0x35   : > { %s43_s28 = ssub.s32 %s2459_s21, %s2959_s15  ;;  %p301_p9 = scmp.eq.s32.totalorder %s1930_s24, 1 }
  0x36   : > { %p44_p10 = scmp.eq.s32.totalorder %s43_s28, 0  ;;  %s2916_s12 = sshll.u32 %s2455_s20, 7 }
  0x37   : > { %p2648_p11 = por %p301_p9, %p59_p13  ;;  %s321_s3 = scalar_lea.hbm %s2898_s0, %s2916_s12 }
  0x38   : > { %s2658_s7 = scalar_select %p44_p10, %s2451_s19, %s46_s16  }
  0x39   : > { %s2939_s13 = scalar_select %p2648_p11, 1, 0 }
  0x3a   : > { %p2665_p12 = pnand %p2124_p4, %p2637_p7  ;;  %s2469_s24 = smov [#allocation5]  }
  0x3b   : > { %s323_s28 = sshll.u32 %s2469_s24, 4  ;;  %s2295_s15 = scalar_lea.hbm %s321_s3, 128  ;;  %s324_s28 = int_to_ptr.vmem [resolvable:$true] %s323_s28 }
  0x3c   : > { %p2296_p13 = scmp.ne.s32.totalorder %s321_s3, %s2295_s15  ;;  %p2297_p0 = pneg %p2665_p12 }
  0x3d   : > { %s2300_s25 = scalar_lea.hbm %s2898_s0, 256  ;;  %p2301_p4 = scmp.lt.s32.totalorder %s321_s3, %s2898_s0 }
  0x3e   : > { %p2298_p2 = pnand %p2297_p0, %p2296_p13  ;;  %p2302_p10 = scmp.lt.s32.totalorder %s2300_s25, %s2295_s15 }
  0x40   : > { %p2299_p9 = pneg %p2298_p2  ;;  %p2303_p6 = por %p2302_p10, %p2301_p4 }
  0x42   : > { %p2304_p11 = pnand %p2303_p6, %p2299_p9 }
  0x44   : > { %2307 = shalt.err (!%p2304_p11)
}
  0x45   : > { %s2308_s24 = scalar_lea.vmem %s324_s28, 128  ;;  %p2316_p3 = scmp.lt.s32.totalorder %s324_s28, %s324_s28 }
  0x46   : > { %p2309_p8 = scmp.ne.s32.totalorder %s324_s28, %s2308_s24  ;;  %p2317_p5 = scmp.lt.s32.totalorder %s2308_s24, %s2308_s24 }
  0x48   : > { %p2311_p1 = pnand %p2309_p8, %p2297_p0  ;;  %p2318_p13 = por %p2317_p5, %p2316_p3 }
  0x4a   : > { %p2312_p7 = pneg %p2311_p1 }
  0x4c   : > { %p2319_p2 = pnand %p2318_p13, %p2312_p7 }
  0x4e   : > { %2322 = shalt.err (!%p2319_p2)
}
  0x4f   : > { %2127 = dma.hbm_to_vmem [thread:$0]  (!%p2665_p12), %s321_s3, 128, %s324_s28, [#allocation6]  }
  0x50   : > { %s2470_s14 = smov [#allocation10]   ;;  %s2471_s15 = smov [#allocation13]  }
  0x51   : > { %s355_s21 = sshll.u32 %s2470_s14, 4  ;;  %s387_s12 = sshll.u32 %s2471_s15, 4  ;;  %s356_s21 = int_to_ptr.vmem [resolvable:$true] %s355_s21  ;;  %s388_s12 = int_to_ptr.vmem [resolvable:$true] %s387_s12 }
  0x52   : > { %s2334_s16 = scalar_lea.vmem %s356_s21, 512  ;;  %p2941_p11 = scmp.ne.s32.totalorder %s2933_s30, 0 }
  0x53   : > { %p2335_p6 = scmp.ne.s32.totalorder %s356_s21, %s2334_s16  ;;  %p2342_p0 = scmp.lt.s32.totalorder %s356_s21, %s356_s21 }
  0x54   : > { %p2942_p9 = pneg %p2941_p11  ;;  %p2343_p4 = scmp.lt.s32.totalorder %s2334_s16, %s2334_s16 }
  0x56   : > { %p2337_p8 = pnand %p2335_p6, %p2942_p9  ;;  %p2344_p3 = por %p2343_p4, %p2342_p0 }
  0x58   : > { %p2338_p1 = pneg %p2337_p8 }
  0x5a   : > { %p2345_p5 = pnand %p2344_p3, %p2338_p1 }
  0x5c   : > { %2348 = shalt.err (!%p2345_p5)
}
  0x5d   : > { %s2943_s17 = smov 8   ;;  %s2944_s3 = smov 128  }
  0x5e   : > { %2133 = dma.hbm_to_vmem [thread:$0]  (!%p2941_p11), %s2903_s5, 512, %s356_s21, [#allocation9], %s2944_s3, %s2944_s3, %s2943_s17  }
  0x5f   : > { %s2360_s24 = scalar_lea.vmem %s388_s12, 512  ;;  %p2945_p12 = pmov %p2942_p9 }
  0x60   : > { %p2361_p7 = scmp.ne.s32.totalorder %s388_s12, %s2360_s24  ;;  %p2368_p2 = scmp.lt.s32.totalorder %s388_s12, %s388_s12 }
  0x61   : > { %p2369_p6 = scmp.lt.s32.totalorder %s2360_s24, %s2360_s24 }
  0x62   : > { %p2363_p10 = pnand %p2361_p7, %p2945_p12 }
  0x63   : > { %p2370_p9 = por %p2369_p6, %p2368_p2 }
  0x64   : > { %p2364_p13 = pneg %p2363_p10 }
  0x66   : > { %p2371_p8 = pnand %p2370_p9, %p2364_p13 }
  0x68   : > { %2374 = shalt.err (!%p2371_p8)
}
  0x69   : > { %2139 = dma.hbm_to_vmem [thread:$0]  (!%p2941_p11), %s2907_s9, 512, %s388_s12, [#allocation12], %s2944_s3, %s2944_s3, %s2943_s17  }
  0x6a   : > { %p2946_p1 = scmp.ne.s32.totalorder %s2932_s27, 0 }
  0x6b   : > { %p2947_p0 = scmp.ne.s32.totalorder (!%p2946_p1), %s2937_s23, 0 }
  0x6c   : > { %406 = sbr.rel (%p2946_p1) target bundleno = 2395 (0x95b), region = 64 }
  0x71   : > { %2426 = dma.done.wait (%p2947_p0), [#allocation6], 128  }
  0x72   : > { %2428 = vsyncadd (%p2947_p0), [#allocation6], 4294967168  ;;  %p2948_p4 = scmp.ne.s32.totalorder %s2931_s26, 0 }
  0x74   : > { %2430 = dma.done.wait (%p2948_p4), [#allocation9], 1024  }
  0x75   : > { %2432 = vsyncadd (%p2948_p4), [#allocation9], 4294966272 }
  0x76   : > { %2434 = dma.done.wait (%p2948_p4), [#allocation12], 1024  }
  0x77   : > { %2436 = vsyncadd (%p2948_p4), [#allocation12], 4294966272  ;;  %vm464_vm0 = vcmask 261120   ;;  %v2715_v0 = vld [vmem:[#allocation5] sm:$0xff]  ;;  %v2472_v8 = vmov 0.0   ;;  %v495_v9 = vld [vmem:[#allocation8 + $0x10] sm:$0xff] }
  0x78   : > { %v465_v1 = vsel %vm464_vm0, %v2715_v0, 0.0  ;;  %v496_v7 = vld [vmem:[#allocation8 + $0x18] sm:$0xff]  ;;  %2011 = vmatprep.subr.mxu0 %v2472_v8  ;;  %vm2473_vm1 = vmmov 0   ;;  %2022 = vmatprep.subr.mxu1 %v2472_v8  ;;  %v494_v10 = vld [vmem:[#allocation8 + $0x8] sm:$0xff]  ;;  %v493_v11 = vld [vmem:[#allocation8] sm:$0xff]  ;;  %vm577_vm2 = vcmask 64512  }
  0x79   : > { %466 = vadd.xlane.f32.xlu0 %v465_v1  ;;  %2019 = vmatprep.mubr.msk.f32.mxu0 %vm2473_vm1, %v2472_v8  ;;  %v2734_v16 = vld [vmem:[%s2899_s1] ss:$0 sm:$0xff]  ;;  %s2474_s16 = smov 80   ;;  %s2475_s17 = smov 96  }
  0x7a   : > { %2012 = vmatpush3.msra.mxu0 %v496_v7  ;;  %2024 = vmatprep.mubr.msk.f32.mxu1 %vm2473_vm1, %v2472_v8  ;;  %v2739_v18 = vld [vmem:[%s2900_s2] ss:$0 sm:$0xff]  ;;  %s2476_s3 = smov 88   ;;  %s2477_s28 = smov 120  }
  0x7b   : > { %2013 = vmatprep.subr.mxu0 %v2472_v8  ;;  %v1943_v21 = vld [vmem:[%s2902_s4] ss:$0 sm:$0xff]  ;;  %s2478_s25 = smov 72   ;;  %s2479_s24 = smov 112  }
  0x7c   : > { %2014 = vmatpush3.msra.mxu0 %v495_v9  ;;  %s2480_s14 = smov 104   ;;  %s2481_s15 = smov 64  }
  0x7d   : > { %2015 = vmatprep.subr.mxu0 %v2472_v8  ;;  %s2482_s26 = smov 48   ;;  %s2483_s27 = smov 40  }
  0x7e   : > { %2016 = vmatpush3.msra.mxu0 %v494_v10  ;;  %s2484_s30 = smov 56   ;;  %p2950_p3 = scmp.ne.s32.totalorder %s2938_s29, 0 }
  0x7f   : > { %2017 = vmatprep.subr.mxu0 %v2472_v8  ;;  %s2485_s12 = smov [#allocation14]  }
  0x80   : > { %2018 = vmatpush3.msra.mxu0 %v493_v11 }
  0x81   : > { %2032 = vmatprep.subr.mxu0 %v2472_v8 }
 0x102   : > { %v467_v2 = vpop.xlane.xlu0 %466 }
 0x103   : > { %v469_v3 = vmul.f32 0.03125, %v467_v2 }
 0x105   : > { %v470_v4 = vsub.f32 %v2715_v0, %v469_v3 }
 0x107   : > { %v471_v5 = vmul.f32 %v470_v4, %v470_v4 }
 0x109   : > { %v472_v6 = vsel %vm464_vm0, %v471_v5, 0.0 }
 0x10a   : > { %473 = vadd.xlane.f32.xlu0 %v472_v6 }
 0x193   : > { %v474_v12 = vpop.xlane.xlu0 %473 }
 0x194   : > { %v475_v13 = vmul.f32 0.03125, %v474_v12 }
 0x196   : > { %v476_v14 = vadd.f32 1e-05, %v475_v13 }
 0x198   : > { %2221 = vrsqrt.f32 %v476_v14 }
 0x1a5   : > { %v2222_v15 = vpop.eup %2221 }
 0x1a6   : > { %v478_v17 = vmul.f32 %v2222_v15, %v470_v4 }
 0x1a8   : > { %v485_v19 = vmul.f32 %v2734_v16, %v478_v17 }
 0x1aa   : > { %v492_v20 = vadd.f32 %v2739_v18, %v485_v19 }
 0x1ac   : > { %2020 = vmatmul.mubr.msk.f32.vlgmr.msra.gmra.mxu0 %vm464_vm0, %v492_v20 }
 0x1ad   : > { %2034 = vmatprep.mubr.msk.f32.mxu0 %vm2473_vm1, %v2472_v8 }
 0x26c   : > { %v573_v22 = vpop.f32.mrf.mxu0 }
 0x26d   : > { %v2749_v23 = vadd.f32 %v1943_v21, %v573_v22 }
 0x26e   : > { %v2021_v24 = vpop.f32.mrf.mxu0 }
 0x26f   : > { %608 = vrot.lane.b32.xlu0 %v2749_v23, %s2474_s16  ;;  %580 = vrot.lane.b32.xlu1 %v2749_v23, %s2475_s17  ;;  %578 = vst.msk [vmem:[#allocation2] sm:$0xff] %vm577_vm2, %v2749_v23  ;;  %s454_s17 = sand.u32 1, %s2447_s18   ;;  %s2379_s16 = sshll.u32 %s2485_s12, 4  ;;  %s2380_s16 = int_to_ptr.vmem [resolvable:$false] %s2379_s16 }
 0x270   : > { %s1803_s23 = scalar_lea.sflag [#allocation7], %s454_s17 }
 0x273   : > { %593 = vrot.lane.b32.xlu1 %v2749_v23, %s2476_s3  ;;  %s1942_s3 = sshll.u32 %s454_s17, 3 }
 0x276   : > { %v637_v31 = vld [vmem:[#allocation2] sm:$0xff] }
 0x277   : > { %588 = vrot.lane.b32.xlu1 %v2749_v23, %s2477_s28 }
 0x27b   : > { %623 = vrot.lane.b32.xlu1 %v2749_v23, %s2478_s25 }
 0x27f   : > { %603 = vrot.lane.b32.xlu1 %v2749_v23, %s2479_s24  ;;  %s456_s24 = scalar_lea.vmem [#allocation14], %s1942_s3  ;;  %s2381_s3 = scalar_lea.vmem %s2380_s16, 256 }
 0x283   : > { %618 = vrot.lane.b32.xlu1 %v2749_v23, %s2480_s14  ;;  %s1817_s14 = sshll.u32 %s456_s24, 4  ;;  %s1818_s14 = int_to_ptr.vmem [resolvable:$true] %s1817_s14 }
 0x284   : > { %s2375_s21 = scalar_lea.vmem %s1818_s14, 128  ;;  %p2382_p12 = scmp.lt.s32.totalorder %s1818_s14, %s2380_s16 }
 0x285   : > { %p2376_p11 = scmp.ne.s32.totalorder %s1818_s14, %s2375_s21  ;;  %p2383_p10 = scmp.lt.s32.totalorder %s2381_s3, %s2375_s21 }
 0x287   : > { %p2377_p5 = pnand %p2376_p11, %p2950_p3  ;;  %p2384_p13 = por %p2383_p10, %p2382_p12 }
 0x289   : > { %p2378_p7 = pneg %p2377_p5 }
 0x28b   : > { %p2385_p2 = pnand %p2384_p13, %p2378_p7 }
 0x2e1   : > { %v609_v25 = vpop.permute.xlu0 %608  ;;  %v581_v26 = vpop.permute.xlu1 %580 }
 0x2e2   : > { %612 = vst.msk [vmem:[#allocation3 + $0x10] sm:$0xff] %vm577_vm2, %v609_v25  ;;  %583 = vst.msk [vmem:[#allocation3] sm:$0xff] %vm577_vm2, %v581_v26 }
 0x2e5   : > { %v594_v27 = vpop.permute.xlu1 %593 }
 0x2e6   : > { %597 = vst.msk [vmem:[#allocation3 + $0x8] sm:$0xff] %vm577_vm2, %v594_v27 }
 0x2e9   : > { %v589_v28 = vpop.permute.xlu1 %588  ;;  %v641_v29 = vld [vmem:[#allocation3] sm:$0xff]  ;;  %v643_v30 = vld [vmem:[#allocation3 + $0x10] sm:$0xff] }
 0x2ea   : > { %592 = vst.msk [vmem:[#allocation2 + $0x8] sm:$0xff] %vm577_vm2, %v589_v28  ;;  %2023 = vmatpush3.xpose.msk.msra.mxu1 %vm577_vm2, %v641_v29  ;;  %2033 = vmatpush3.xpose.msk.msra.mxu0 %vm577_vm2, %v643_v30 }
 0x2eb   : > { %2027 = vmatprep.subr.mxu1 %v2472_v8  ;;  %2042 = vmatprep.subr.mxu0 %v2472_v8 }
 0x2ed   : > { %v624_v32 = vpop.permute.xlu1 %623  ;;  %2025 = vmatmul.mubr.msk.f32.vlgmr.msra.gmra.mxu1 %vm577_vm2, %v637_v31  ;;  %v642_v33 = vld [vmem:[#allocation3 + $0x8] sm:$0xff] }
 0x2ee   : > { %627 = vst.msk [vmem:[#allocation3 + $0x18] sm:$0xff] %vm577_vm2, %v624_v32  ;;  %2028 = vmatpush3.xpose.msk.msra.mxu1 %vm577_vm2, %v642_v33  ;;  %2029 = vmatprep.mubr.msk.f32.mxu1 %vm2473_vm1, %v2472_v8  ;;  %v1290_v32 = vld [vmem:[#allocation10] sm:$0xff]  ;;  %v1291_v33 = vld [vmem:[#allocation10 + $0x8] sm:$0xff] }
 0x2ef   : > { %2037 = vmatprep.subr.mxu1 %v2472_v8 }
 0x2f1   : > { %v604_v34 = vpop.permute.xlu1 %603  ;;  %v638_v35 = vld [vmem:[#allocation2 + $0x8] sm:$0xff] }
 0x2f2   : > { %607 = vst.msk [vmem:[#allocation2 + $0x10] sm:$0xff] %vm577_vm2, %v604_v34  ;;  %2030 = vmatmul.mubr.msk.f32.vlgmr.msra.gmra.mxu1 %vm577_vm2, %v638_v35  ;;  %v1292_v34 = vld [vmem:[#allocation10 + $0x10] sm:$0xff] }
 0x2f3   : > { %2039 = vmatprep.mubr.msk.f32.mxu1 %vm2473_vm1, %v2472_v8 }
 0x2f5   : > { %v619_v36 = vpop.permute.xlu1 %618  ;;  %v644_v37 = vld [vmem:[#allocation3 + $0x18] sm:$0xff] }
 0x2f6   : > { %622 = vst.msk [vmem:[#allocation2 + $0x18] sm:$0xff] %vm577_vm2, %v619_v36  ;;  %2038 = vmatpush3.xpose.msk.msra.mxu1 %vm577_vm2, %v644_v37 }
 0x2f7   : > { %2047 = vmatprep.subr.mxu1 %v2472_v8 }
 0x2f9   : > { %v639_v38 = vld [vmem:[#allocation2 + $0x10] sm:$0xff] }
 0x2fa   : > { %2035 = vmatmul.mubr.msk.f32.vlgmr.msra.gmra.mxu0 %vm577_vm2, %v639_v38  ;;  %v1293_v38 = vld [vmem:[#allocation10 + $0x18] sm:$0xff] }
 0x2fb   : > { %2044 = vmatprep.mubr.msk.f32.mxu0 %vm2473_vm1, %v2472_v8 }
 0x2fd   : > { %v640_v39 = vld [vmem:[#allocation2 + $0x18] sm:$0xff] }
 0x2fe   : > { %2040 = vmatmul.mubr.msk.f32.vlgmr.msra.gmra.mxu1 %vm577_vm2, %v640_v39 }
 0x2ff   : > { %2049 = vmatprep.mubr.msk.f32.mxu1 %vm2473_vm1, %v2472_v8 }
 0x3ad   : > { %v718_v40 = vpop.f32.mrf.mxu1 }
 0x3ae   : > { %v950_v41 = vsel %vm577_vm2, %v718_v40, -inf }
 0x3af   : > { %951 = vmax.xlane.f32.xlu1 %v950_v41  ;;  %v2026_v42 = vpop.f32.mrf.mxu1 }
 0x3b2   : > { %v794_v43 = vpop.f32.mrf.mxu1 }
 0x3b3   : > { %v953_v44 = vsel %vm577_vm2, %v794_v43, -inf }
 0x3b4   : > { %954 = vmax.xlane.f32.xlu0 %v953_v44  ;;  %v2031_v45 = vpop.f32.mrf.mxu1 }
 0x3ba   : > { %v870_v46 = vpop.f32.mrf.mxu0 }
 0x3bb   : > { %v956_v47 = vsel %vm577_vm2, %v870_v46, -inf }
 0x3bc   : > { %957 = vmax.xlane.f32.xlu1 %v956_v47  ;;  %v2036_v48 = vpop.f32.mrf.mxu0 }
 0x3be   : > { %v946_v49 = vpop.f32.mrf.mxu1 }
 0x3bf   : > { %v959_v50 = vsel %vm577_vm2, %v946_v49, -inf }
 0x3c0   : > { %960 = vmax.xlane.f32.xlu0 %v959_v50  ;;  %v2041_v51 = vpop.f32.mrf.mxu1 }
 0x3cd   : > { %584 = vrot.lane.b32.xlu1 %v2749_v23, %s2481_s15  ;;  %s2949_s15 = sshll.u32 %s2455_s20, 7 }
 0x438   : > { %v952_v52 = vpop.xlane.xlu1 %951 }
 0x439   : > { %v962_v53 = vsub.f32 %v718_v40, %v952_v52 }
 0x43b   : > { %v966_v54 = vmul.f32 1.442695, %v962_v53 }
 0x43d   : > { %2223 = vpow2.f32 %v966_v54  ;;  %v955_v55 = vpop.xlane.xlu0 %954 }
 0x43e   : > { %v963_v56 = vsub.f32 %v794_v43, %v955_v55 }
 0x440   : > { %v968_v57 = vmul.f32 1.442695, %v963_v56 }
 0x442   : > { %2225 = vpow2.f32 %v968_v57 }
 0x445   : > { %v958_v58 = vpop.xlane.xlu1 %957 }
 0x446   : > { %v964_v59 = vsub.f32 %v870_v46, %v958_v58  ;;  %v1961_v46 = vld [vmem:[%s2904_s6] ss:$0 sm:$0xff] }
 0x448   : > { %v970_v60 = vmul.f32 1.442695, %v964_v59 }
 0x449   : > { %v961_v61 = vpop.xlane.xlu0 %960  ;;  %v585_v62 = vpop.permute.xlu1 %584 }
 0x44a   : > { %v2224_v63 = vpop.eup %2223  ;;  %2227 = vpow2.f32 %v970_v60  ;;  %v965_v1 = vsub.f32 %v946_v49, %v961_v61  ;;  %587 = vst.msk [vmem:[#allocation4] sm:$0xff] %vm577_vm2, %v585_v62 }
 0x44b   : > { %v974_v2 = vsel %vm577_vm2, %v2224_v63, 0.0 }
 0x44c   : > { %v972_v3 = vmul.f32 1.442695, %v965_v1  ;;  %975 = vadd.xlane.f32.xlu1 %v974_v2  ;;  %v1630_v1 = vld [vmem:[#allocation11 + $0x18] sm:$0xff]  ;;  %v1629_v2 = vld [vmem:[#allocation11 + $0x10] sm:$0xff] }
 0x44e   : > { %2229 = vpow2.f32 %v972_v3  ;;  %v1628_v3 = vld [vmem:[#allocation11 + $0x8] sm:$0xff] }
 0x44f   : > { %v2226_v4 = vpop.eup %2225 }
 0x450   : > { %v977_v5 = vsel %vm577_vm2, %v2226_v4, 0.0 }
 0x451   : > { %978 = vadd.xlane.f32.xlu0 %v977_v5  ;;  %v994_v6 = vld [vmem:[#allocation4] sm:$0xff] }
 0x452   : > { %2043 = vmatpush3.msra.mxu0 %v994_v6 }
 0x453   : > { %2052 = vmatprep.subr.mxu0 %v2472_v8 }
 0x457   : > { %v2228_v7 = vpop.eup %2227 }
 0x458   : > { %v980_v9 = vsel %vm577_vm2, %v2228_v7, 0.0 }
 0x459   : > { %981 = vadd.xlane.f32.xlu1 %v980_v9 }
 0x45b   : > { %v2230_v10 = vpop.eup %2229 }
 0x45c   : > { %v983_v11 = vsel %vm577_vm2, %v2230_v10, 0.0 }
 0x45d   : > { %984 = vadd.xlane.f32.xlu0 %v983_v11 }
 0x46a   : > { %613 = vrot.lane.b32.xlu1 %v2749_v23, %s2482_s26 }
 0x46e   : > { %628 = vrot.lane.b32.xlu1 %v2749_v23, %s2483_s27 }
 0x473   : > { %598 = vrot.lane.b32.xlu0 %v2749_v23, %s2484_s30  ;;  %s1815_s30 = scalar_lea.hbm %s2909_s11, %s2949_s15 }
 0x4d5   : > { %v976_v12 = vpop.xlane.xlu1 %975 }
 0x4d6   : > { %2231 = vrcp.f32 %v976_v12  ;;  %v1719_v12 = vld [vmem:[#allocation13 + $0x18] sm:$0xff] }
 0x4da   : > { %v979_v13 = vpop.xlane.xlu0 %978 }
 0x4db   : > { %2233 = vrcp.f32 %v979_v13  ;;  %v1718_v13 = vld [vmem:[#allocation13 + $0x10] sm:$0xff] }
 0x4e2   : > { %v982_v14 = vpop.xlane.xlu1 %981 }
 0x4e3   : > { %v2232_v15 = vpop.eup %2231  ;;  %2235 = vrcp.f32 %v982_v14  ;;  %v1717_v14 = vld [vmem:[#allocation13 + $0x8] sm:$0xff] }
 0x4e4   : > { %v990_v17 = vmul.f32 %v2232_v15, %v2224_v63  ;;  %v1716_v15 = vld [vmem:[#allocation13] sm:$0xff] }
 0x4e6   : > { %v985_v19 = vpop.xlane.xlu0 %984  ;;  %2045 = vmatmul.mubr.msk.f32.vlgmr.msra.gmra.mxu0 %vm577_vm2, %v990_v17  ;;  %v614_v20 = vpop.permute.xlu1 %613 }
 0x4e7   : > { %2237 = vrcp.f32 %v985_v19  ;;  %617 = vst.msk [vmem:[#allocation4 + $0x10] sm:$0xff] %vm577_vm2, %v614_v20  ;;  %2054 = vmatprep.mubr.msk.f32.mxu0 %vm2473_vm1, %v2472_v8 }
 0x4e8   : > { %v2234_v24 = vpop.eup %2233 }
 0x4e9   : > { %v991_v28 = vmul.f32 %v2234_v24, %v2226_v4 }
 0x4ea   : > { %v599_v21 = vpop.permute.xlu0 %598  ;;  %v629_v22 = vpop.permute.xlu1 %628 }
 0x4eb   : > { %602 = vst.msk [vmem:[#allocation4 + $0x8] sm:$0xff] %vm577_vm2, %v599_v21  ;;  %632 = vst.msk [vmem:[#allocation4 + $0x18] sm:$0xff] %vm577_vm2, %v629_v22 }
 0x4ee   : > { %v996_v23 = vld [vmem:[#allocation4 + $0x10] sm:$0xff] }
 0x4ef   : > { %2053 = vmatpush3.msra.mxu0 %v996_v23 }
 0x4f0   : > { %v2236_v25 = vpop.eup %2235  ;;  %2062 = vmatprep.subr.mxu0 %v2472_v8 }
 0x4f1   : > { %v992_v26 = vmul.f32 %v2236_v25, %v2228_v7 }
 0x4f2   : > { %v995_v27 = vld [vmem:[#allocation4 + $0x8] sm:$0xff]  ;;  %v997_v30 = vld [vmem:[#allocation4 + $0x18] sm:$0xff] }
 0x4f3   : > { %2048 = vmatpush3.msra.mxu1 %v995_v27  ;;  %2055 = vmatmul.mubr.msk.f32.vlgmr.msra.gmra.mxu0 %vm577_vm2, %v992_v26 }
 0x4f4   : > { %v2238_v29 = vpop.eup %2237  ;;  %2050 = vmatmul.mubr.msk.f32.vlgmr.msra.gmra.mxu1 %vm577_vm2, %v991_v28  ;;  %2057 = vmatprep.subr.mxu1 %v2472_v8 }
 0x4f5   : > { %2058 = vmatpush3.msra.mxu1 %v997_v30  ;;  %2059 = vmatprep.mubr.msk.f32.mxu1 %vm2473_vm1, %v2472_v8  ;;  %v993_v31 = vmul.f32 %v2238_v29, %v2230_v10 }
 0x4f6   : > { %2064 = vmatprep.mubr.msk.f32.mxu0 %vm2473_vm1, %v2472_v8  ;;  %2067 = vmatprep.subr.mxu1 %v2472_v8 }
 0x4f7   : > { %2063 = vmatpush3.msra.mxu0 %v1290_v32 }
 0x4f8   : > { %2060 = vmatmul.mubr.msk.f32.vlgmr.msra.gmra.mxu1 %vm577_vm2, %v993_v31  ;;  %2072 = vmatprep.subr.mxu0 %v2472_v8 }
 0x4f9   : > { %2069 = vmatprep.mubr.msk.f32.mxu1 %vm2473_vm1, %v2472_v8  ;;  %2068 = vmatpush3.msra.mxu1 %v1291_v33 }
 0x4fa   : > { %2077 = vmatprep.subr.mxu1 %v2472_v8 }
 0x5a6   : > { %v1067_v35 = vpop.f32.mrf.mxu0 }
 0x5a7   : > { %2065 = vmatmul.mubr.msk.f32.vlgmr.msra.gmra.mxu0 %vm577_vm2, %v1067_v35 }
 0x5a8   : > { %v2046_v36 = vpop.f32.mrf.mxu0  ;;  %2073 = vmatpush3.msra.mxu0 %v1292_v34  ;;  %2074 = vmatprep.mubr.msk.f32.mxu0 %vm2473_vm1, %v2472_v8 }
 0x5a9   : > { %2082 = vmatprep.subr.mxu0 %v2472_v8 }
 0x5b3   : > { %v1213_v37 = vpop.f32.mrf.mxu0 }
 0x5b4   : > { %v1140_v39 = vpop.f32.mrf.mxu1  ;;  %2075 = vmatmul.mubr.msk.f32.vlgmr.msra.gmra.mxu0 %vm577_vm2, %v1213_v37 }
 0x5b5   : > { %v2056_v40 = vpop.f32.mrf.mxu0  ;;  %2070 = vmatmul.mubr.msk.f32.vlgmr.msra.gmra.mxu1 %vm577_vm2, %v1140_v39  ;;  %2090 = vmatprep.mubr.msk.f32.mxu0 %vm2473_vm1, %v2472_v8 }
 0x5b6   : > { %v2051_v41 = vpop.f32.mrf.mxu1  ;;  %2078 = vmatpush3.msra.mxu1 %v1293_v38  ;;  %2079 = vmatprep.mubr.msk.f32.mxu1 %vm2473_vm1, %v2472_v8 }
 0x5b7   : > { %2093 = vmatprep.subr.mxu1 %v2472_v8  ;;  %2083 = vmatpush3.msra.mxu0 %v1630_v1 }
 0x5b8   : > { %v1286_v42 = vpop.f32.mrf.mxu1  ;;  %2084 = vmatprep.subr.mxu0 %v2472_v8 }
 0x5b9   : > { %2080 = vmatmul.mubr.msk.f32.vlgmr.msra.gmra.mxu1 %vm577_vm2, %v1286_v42  ;;  %2085 = vmatpush3.msra.mxu0 %v1629_v2 }
 0x5ba   : > { %v2061_v43 = vpop.f32.mrf.mxu1  ;;  %2101 = vmatprep.mubr.msk.f32.mxu1 %vm2473_vm1, %v2472_v8  ;;  %2086 = vmatprep.subr.mxu0 %v2472_v8 }
 0x5bb   : > { %2087 = vmatpush3.msra.mxu0 %v1628_v3  ;;  %2094 = vmatpush3.msra.mxu1 %v1719_v12 }
 0x5bc   : > { %2088 = vmatprep.subr.mxu0 %v2472_v8  ;;  %2095 = vmatprep.subr.mxu1 %v2472_v8 }
 0x5bd   : > { %2096 = vmatpush3.msra.mxu1 %v1718_v13 }
 0x5be   : > { %2097 = vmatprep.subr.mxu1 %v2472_v8 }
 0x5bf   : > { %2098 = vmatpush3.msra.mxu1 %v1717_v14 }
 0x5c0   : > { %2099 = vmatprep.subr.mxu1 %v2472_v8  ;;  %v1964_v8 = vld [vmem:[%s2908_s10] ss:$0 sm:$0xff] }
 0x5c1   : > { %2100 = vmatpush3.msra.mxu1 %v1716_v15 }
 0x667   : > { %v1363_v44 = vpop.f32.mrf.mxu0 }
 0x668   : > { %v1593_v47 = vadd.f32 %v1961_v46, %v1363_v44 }
 0x669   : > { %v2066_v45 = vpop.f32.mrf.mxu0 }
 0x674   : > { %v1509_v48 = vpop.f32.mrf.mxu0 }
 0x675   : > { %v1436_v49 = vpop.f32.mrf.mxu1 }
 0x676   : > { %v1594_v50 = vadd.f32 %v1593_v47, %v1436_v49  ;;  %v2076_v51 = vpop.f32.mrf.mxu0 }
 0x677   : > { %v2071_v52 = vpop.f32.mrf.mxu1 }
 0x678   : > { %v1595_v53 = vadd.f32 %v1594_v50, %v1509_v48 }
 0x679   : > { %v1582_v54 = vpop.f32.mrf.mxu1 }
 0x67a   : > { %v1596_v55 = vadd.f32 %v1595_v53, %v1582_v54 }
 0x67b   : > { %v2081_v56 = vpop.f32.mrf.mxu1 }
 0x67c   : > { %v1597_v57 = vadd.f32 %v1596_v55, %v2715_v0  ;;  %v1627_v0 = vld [vmem:[#allocation11] sm:$0xff] }
 0x67d   : > { %2089 = vmatpush3.msra.mxu0 %v1627_v0 }
 0x67e   : > { %v1599_v58 = vsel %vm464_vm0, %v1597_v57, 0.0 }
 0x67f   : > { %1600 = vadd.xlane.f32.xlu0 %v1599_v58 }
 0x708   : > { %v1601_v59 = vpop.xlane.xlu0 %1600 }
 0x709   : > { %v1603_v60 = vmul.f32 0.03125, %v1601_v59 }
 0x70b   : > { %v1604_v61 = vsub.f32 %v1597_v57, %v1603_v60 }
 0x70d   : > { %v1605_v62 = vmul.f32 %v1604_v61, %v1604_v61 }
 0x70f   : > { %v1606_v63 = vsel %vm464_vm0, %v1605_v62, 0.0 }
 0x710   : > { %1607 = vadd.xlane.f32.xlu1 %v1606_v63 }
 0x799   : > { %v1608_v4 = vpop.xlane.xlu1 %1607 }
 0x79a   : > { %v1609_v5 = vmul.f32 0.03125, %v1608_v4 }
 0x79c   : > { %v1610_v6 = vadd.f32 1e-05, %v1609_v5 }
 0x79e   : > { %2239 = vrsqrt.f32 %v1610_v6 }
 0x7ab   : > { %v2240_v7 = vpop.eup %2239 }
 0x7ac   : > { %v1612_v9 = vmul.f32 %v2240_v7, %v1604_v61 }
 0x7ae   : > { %v1619_v10 = vmul.f32 %v2734_v16, %v1612_v9  ;;  %v1962_v16 = vld [vmem:[%s2906_s8] ss:$0 sm:$0xff] }
 0x7b0   : > { %v1626_v11 = vadd.f32 %v2739_v18, %v1619_v10 }
 0x7b2   : > { %2091 = vmatmul.mubr.msk.f32.vlgmr.msra.gmra.mxu0 %vm464_vm0, %v1626_v11 }
 0x872   : > { %v1707_v18 = vpop.f32.mrf.mxu0 }
 0x873   : > { %v1708_v17 = vadd.f32 %v1962_v16, %v1707_v18 }
 0x874   : > { %v2092_v19 = vpop.f32.mrf.mxu0 }
 0x875   : > { %v1712_v20 = vmul.f32 0.70710677, %v1708_v17  ;;  %v1711_v22 = vmul.f32 0.5, %v1708_v17 }
 0x877   : > { %2241 = verf.f32 %v1712_v20 }
 0x884   : > { %v2242_v21 = vpop.eup %2241 }
 0x885   : > { %v1714_v23 = vadd.f32 1.0, %v2242_v21 }
 0x887   : > { %v1715_v24 = vmul.f32 %v1714_v23, %v1711_v22 }
 0x889   : > { %2102 = vmatmul.mubr.msk.f32.vlgmr.msra.gmra.mxu1 %vm464_vm0, %v1715_v24 }
 0x949   : > { %v1796_v25 = vpop.f32.mrf.mxu1 }
 0x94a   : > { %v1797_v26 = vadd.f32 %v1964_v8, %v1796_v25 }
 0x94b   : > { %v2103_v27 = vpop.f32.mrf.mxu1 }
 0x94c   : > { %v1800_v28 = vadd.f32 %v1797_v26, %v1597_v57 }
 0x94e   : > { %1801 = vst.msk [vmem:[%s456_s24] sm:$0xff] %vm464_vm0, %v1800_v28 }
 0x94f   : > { %2388 = shalt.err (!%p2385_p2)
}
 0x950   : > { %s2389_s20 = scalar_lea.hbm %s1815_s30, 128  ;;  %s2393_s25 = scalar_lea.hbm %s2909_s11, 256 }
 0x951   : > { %p2390_p6 = scmp.ne.s32.totalorder %s1815_s30, %s2389_s20  ;;  %p2394_p1 = scmp.lt.s32.totalorder %s1815_s30, %s2909_s11 }
 0x952   : > { %p2395_p0 = scmp.lt.s32.totalorder %s2393_s25, %s2389_s20 }
 0x953   : > { %p2391_p9 = pnand %p2390_p6, %p2950_p3 }
 0x954   : > { %p2396_p4 = por %p2395_p0, %p2394_p1 }
 0x955   : > { %p2392_p8 = pneg %p2391_p9 }
 0x957   : > { %p2397_p11 = pnand %p2396_p4, %p2392_p8 }
 0x959   : > { %2400 = shalt.err (!%p2397_p11)
}
 0x95a   : > { %2122 = dma.vmem_to_hbm [thread:$0]  (%p2950_p3), %s1818_s14, 128, %s1815_s30, %s1803_s23  }
 0x95b PF: > { %s2951_s26 = sld [smem:[#allocation19_spill]]  ;;  %p2152_p5 = scmp.ge.s32.totalorder %s2463_s22, 2 }
 0x95c   : > { %p2952_p7 = scmp.ne.s32.totalorder %s2939_s13, 0 }
 0x95e   : > { %p2141_p12 = pnand %p2152_p5, %p2952_p7 }
 0x960   : > { %p2142_p10 = pneg %p2141_p12 }
 0x961   : > { %s1829_s27 = sand.u32 1, %s2951_s26  }
 0x962   : > { %s1830_s21 = scalar_lea.sflag [#allocation7], %s1829_s27 }
 0x963   : > { %2438 = dma.done.wait (%p2142_p10), %s1830_s21, 128  }
 0x964   : > { %2440 = vsyncadd (%p2142_p10), %s1830_s21, 4294967168  ;;  %s27_s22 = sadd.s32 1, %s2463_s22   ;;  %s2953_s20 = sld [smem:[#allocation20_spill]] }
 0x965   : > { %p24_p13 = scmp.ge.s32.totalorder %s27_s22, 4   ;;  %s2954_s21 = sld [smem:[#allocation21_spill]] }
 0x966   : > { %s2955_s17 = smov %s2447_s18  ;;  %s2956_s18 = smov %s2451_s19 }
 0x967   : > { %s2957_s19 = smov %s2658_s7  ;;  %26 = sbr.rel (!%p24_p13) target bundleno = 10 (0xa), region = 133 }
 0x96c   :  { %1835 = vsyncpa [#allocation6], 1 }
 0x96d   :  { %1837 = vsyncpa [#allocation6 + $0x1], 1 }
 0x96e   :  { %1838 = vsyncpa [#allocation9], 1 }
 0x96f   :  { %1839 = vsyncpa [#allocation12], 1 }
 0x970   :  { %1840 = vsyncpa [#allocation7], 1 }
 0x971   :  { %1842 = vsyncpa [#allocation7 + $0x1], 1 }

// kernel: tpu_custom_call.1
= control target key start
LH: loop header
LB: loop body
LE: loop exit
PB: predicated region body
PF: predicated region fallthrough
CT: control target
= control target key end

     0   :  { %s2931_s0 = inlined_call_operand.hbm [shape: f32[2,8,32], index: 0, kind: input, shape index: {}]   ;;  %s2932_s1 = inlined_call_operand.vmem [shape: f32[1,32], index: 1, kind: input, shape index: {}]   ;;  %s2933_s2 = inlined_call_operand.vmem [shape: f32[1,32], index: 2, kind: input, shape index: {}]   ;;  %s2934_s3 = inlined_call_operand.hbm [shape: f32[32,96], index: 3, kind: input, shape index: {}]   ;;  %s2935_s4 = inlined_call_operand.vmem [shape: f32[1,96], index: 4, kind: input, shape index: {}]   ;;  %s2936_s5 = inlined_call_operand.hbm [shape: f32[4,8,32], index: 5, kind: input, shape index: {}]   ;;  %s2937_s6 = inlined_call_operand.vmem [shape: f32[1,32], index: 6, kind: input, shape index: {}]   ;;  %s2938_s7 = inlined_call_operand.hbm [shape: f32[32,32], index: 7, kind: input, shape index: {}]   ;;  %s2939_s8 = inlined_call_operand.vmem [shape: f32[1,32], index: 8, kind: input, shape index: {}]   ;;  %s2940_s9 = inlined_call_operand.hbm [shape: f32[32,32], index: 9, kind: input, shape index: {}]   ;;  %s2941_s10 = inlined_call_operand.vmem [shape: f32[1,32], index: 10, kind: input, shape index: {}]   ;;  %s2942_s11 = inlined_call_operand.hbm [shape: f32[2,8,32], index: 11, kind: output, shape index: {}]  }
   0x1   :  { %2947 = sst [smem:[#allocation23_spill]] %s2934_s3 }
   0x2   :  { %2948 = sst [smem:[#allocation24_spill]] %s2936_s5 }
   0x3   :  { %2949 = sst [smem:[#allocation25_spill]] %s2938_s7 }
   0x4   :  { %2950 = sst [smem:[#allocation26_spill]] %s2940_s9 }
   0x5   :  { %16 = vsyncpa [#allocation6], 0 }
   0x6   :  { %18 = vsyncpa [#allocation6 + $0x1], 0 }
   0x7   :  { %19 = vsyncpa [#allocation9], 0 }
   0x8   :  { %20 = vsyncpa [#allocation12], 0 }
   0x9   :  { %21 = vsyncpa [#allocation7], 0 }
   0xa   :  { %23 = vsyncpa [#allocation7 + $0x1], 0  ;;  %s2576_s17 = smov 0   ;;  %s2578_s18 = smov 0  }
   0xb   :  { %s2580_s19 = smov 0   ;;  %s2582_s20 = smov 0  }
   0xc   :  { %s2584_s21 = smov 0   ;;  %s2586_s22 = smov 0  }
   0xd LB: > { %2951 = sst [smem:[#allocation19_spill]] %s2473_s17  ;;  %s2943_s23 = sadd.s32 4294967295, %s2493_s22   ;;  %s2493_s22 = sphi %s2586_s22, %s29_s22   ;;  %s2489_s21 = sphi %s2584_s21, %s2973_s21   ;;  %s2485_s20 = sphi %s2582_s20, %s2972_s20   ;;  %s2481_s19 = sphi %s2580_s19, %s2976_s19   ;;  %s2477_s18 = sphi %s2578_s18, %s2975_s18   ;;  %s2473_s17 = sphi %s2576_s17, %s2974_s17  }
   0xe   : > { %2952 = sst [smem:[#allocation20_spill]] %s2489_s21  ;;  %p1957_p0 = scmp.ge.s32.totalorder %s2493_s22, 1 }
   0xf   : > { %p2610_p1 = scmp.eq.s32.totalorder %s2943_s23, 0  ;;  %p310_p2 = scmp.lt.s32.totalorder %s2493_s22, 3 }
  0x10   : > { %s2495_s26 = smov [#allocation8]   ;;  %s2496_s29 = smov [#allocation11]  }
  0x11   : > { %p2615_p3 = pnand %p1957_p0, %p310_p2  ;;  %s328_s27 = sshll.u32 %s2495_s26, 4  ;;  %s329_s27 = int_to_ptr.vmem [resolvable:$true] %s328_s27 }
  0x12   : > { %s360_s30 = sshll.u32 %s2496_s29, 4  ;;  %s2497_s12 = smov [#allocation10]   ;;  %s361_s30 = int_to_ptr.vmem [resolvable:$true] %s360_s30 }
  0x13   : > { %p2153_p4 = pneg %p2615_p3  ;;  %s344_s13 = sshll.u32 %s2497_s12, 4  ;;  %s345_s13 = int_to_ptr.vmem [resolvable:$true] %s344_s13 }
  0x14   : > { %s2284_s14 = scalar_lea.vmem %s329_s27, 512  ;;  %p2292_p11 = scmp.lt.s32.totalorder %s329_s27, %s329_s27 }
  0x15   : > { %p2624_p6 = pnand %p2153_p4, %p2610_p1  ;;  %p2285_p8 = scmp.ne.s32.totalorder %s329_s27, %s2284_s14 }
  0x16   : > { %p2293_p12 = scmp.lt.s32.totalorder %s2284_s14, %s2284_s14 }
  0x17   : > { %p2275_p7 = pneg %p2624_p6 }
  0x18   : > { %p2294_p13 = por %p2293_p12, %p2292_p11 }
  0x19   : > { %p2287_p9 = pnand %p2285_p8, %p2275_p7 }
  0x1b   : > { %p2288_p10 = pneg %p2287_p9 }
  0x1d   : > { %p2295_p0 = pnand %p2294_p13, %p2288_p10 }
  0x1f   : > { %2298 = shalt.err (!%p2295_p0)
}
  0x20   : > { %s2498_s15 = smov 128   ;;  %s2499_s16 = smov 8  }
  0x21   : > { %s2956_s3 = sld [smem:[#allocation23_spill]]  ;;  %s2310_s12 = scalar_lea.vmem %s361_s30, 512 }
  0x22   : > { %p2311_p2 = scmp.ne.s32.totalorder %s361_s30, %s2310_s12  ;;  %p2318_p9 = scmp.lt.s32.totalorder %s361_s30, %s361_s30 }
  0x23   : > { %p2319_p10 = scmp.lt.s32.totalorder %s2310_s12, %s2310_s12 }
  0x24   : > { %p2313_p4 = pnand %p2311_p2, %p2275_p7 }
  0x25   : > { %p2320_p11 = por %p2319_p10, %p2318_p9 }
  0x26   : > { %p2314_p8 = pneg %p2313_p4 }
  0x27   : > { %2156 = dma.hbm_to_vmem [thread:$0]  (!%p2624_p6), %s2956_s3, 512, %s329_s27, [#allocation9], %s2498_s15, %s2498_s15, %s2499_s16  }
  0x28   : > { %p2321_p12 = pnand %p2320_p11, %p2314_p8 }
  0x2a   : > { %2324 = shalt.err (!%p2321_p12)
}
  0x2b   : > { %s2957_s7 = sld [smem:[#allocation25_spill]]  ;;  %s2336_s27 = scalar_lea.vmem %s345_s13, 512 }
  0x2c   : > { %p2337_p13 = scmp.ne.s32.totalorder %s345_s13, %s2336_s27  ;;  %p2344_p4 = scmp.lt.s32.totalorder %s345_s13, %s345_s13 }
  0x2d   : > { %p2345_p8 = scmp.lt.s32.totalorder %s2336_s27, %s2336_s27 }
  0x2e   : > { %p2339_p0 = pnand %p2337_p13, %p2275_p7 }
  0x2f   : > { %p2346_p9 = por %p2345_p8, %p2344_p4 }
  0x30   : > { %p2340_p2 = pneg %p2339_p0 }
  0x31   : > { %2162 = dma.hbm_to_vmem [thread:$0]  (!%p2624_p6), %s2957_s7, 512, %s361_s30, [#allocation12], %s2498_s15, %s2498_s15, %s2499_s16  }
  0x32   : > { %p2347_p10 = pnand %p2346_p9, %p2340_p2 }
  0x34   : > { %2350 = shalt.err (!%p2347_p10)
}
  0x35   : > { %s2958_s5 = sld [smem:[#allocation24_spill]]  ;;  %s2500_s30 = smov [#allocation13]  }
  0x36   : > { %s376_s29 = sshll.u32 %s2500_s30, 4  ;;  %s377_s29 = int_to_ptr.vmem [resolvable:$true] %s376_s29 }
  0x37   : > { %s2362_s12 = scalar_lea.vmem %s377_s29, 512  ;;  %p2370_p0 = scmp.lt.s32.totalorder %s377_s29, %s377_s29 }
  0x38   : > { %p2363_p11 = scmp.ne.s32.totalorder %s377_s29, %s2362_s12  ;;  %p2371_p2 = scmp.lt.s32.totalorder %s2362_s12, %s2362_s12 }
  0x3a   : > { %p2365_p12 = pnand %p2363_p11, %p2275_p7  ;;  %p2372_p4 = por %p2371_p2, %p2370_p0 }
  0x3b   : > { %2159 = dma.hbm_to_vmem [thread:$0]  (!%p2624_p6), %s2958_s5, 512, %s345_s13, [#allocation9], %s2498_s15, %s2498_s15, %s2499_s16  }
  0x3c   : > { %p2366_p13 = pneg %p2365_p12 }
  0x3e   : > { %p2373_p8 = pnand %p2372_p4, %p2366_p13 }
  0x40   : > { %2376 = shalt.err (!%p2373_p8)
}
  0x41   : > { %s2959_s9 = sld [smem:[#allocation26_spill]]  ;;  %s1956_s28 = sadd.s32 4294967294, %s2493_s22  }
  0x42   : > { %s41_s27 = sadd.s32 1, %s2489_s21  ;;  %s48_s23 = sadd.s32 1, %s2481_s19 }
  0x43   : > { %p43_p7 = scmp.ge.s32.totalorder %s41_s27, 2  ;;  %p55_p9 = scmp.ne.s32.totalorder %s2481_s19, %s2477_s18 }
  0x44   : > { %p56_p10 = scmp.eq.s32.totalorder %s2493_s22, 0  ;;  %p61_p12 = scmp.ne.s32.totalorder %s2477_s18, %s2473_s17 }
  0x45   : > { %s2978_s27 = smov (%p43_p7, %s41_s27), 0  ;;  %p303_p4 = scmp.eq.s32.totalorder %s1956_s28, 1 }
  0x46   : > { %2960 = sst [smem:[#allocation21_spill]] %s2978_s27  ;;  %p2682_p11 = por %p56_p10, %p55_p9 }
  0x47   : > { %2165 = dma.hbm_to_vmem [thread:$0]  (!%p2624_p6), %s2959_s9, 512, %s377_s29, [#allocation12], %s2498_s15, %s2498_s15, %s2499_s16  }
  0x48   : > { %s45_s15 = ssub.s32 %s2489_s21, %s2978_s27  ;;  %s2962_s16 = sadd.s32 4294967295, %s2493_s22  }
  0x49   : > { %p297_p6 = scmp.eq.s32.totalorder %s2962_s16, 1  ;;  %p46_p13 = scmp.eq.s32.totalorder %s45_s15, 0 }
  0x4a   : > { %p2694_p0 = por %p2610_p1, %p61_p12  ;;  %p2705_p8 = por %p303_p4, %p61_p12 }
  0x4b   : > { %p2698_p2 = por %p297_p6, %p55_p9  ;;  %p2178_p7 = scmp.lt.s32.totalorder %s2493_s22, 2 }
  0x4c   : > { %s2703_s12 = scalar_select %p46_p13, %s2481_s19, %s48_s23  }
  0x4d   : > { %s2966_s13 = scalar_select %p2705_p8, 1, 0 }
  0x4e   : > { %2965 = sst [smem:[#allocation22_spill]] %s2703_s12  ;;  %s393_s14 = sand.u32 1, %s2481_s19  }
  0x4f   : > { %s1964_s16 = sshll.u32 %s2489_s21, 7  ;;  %s1963_s15 = sshll.u32 %s393_s14, 3 }
  0x50   : > { %s402_s7 = scalar_lea.hbm %s2931_s0, %s1964_s16  ;;  %s397_s9 = scalar_lea.vmem [#allocation5], %s1963_s15 }
  0x51   : > { %s404_s27 = sshll.u32 %s397_s9, 4  ;;  %p2717_p9 = pnand %p2178_p7, %p2682_p11  ;;  %s405_s27 = int_to_ptr.vmem [resolvable:$true] %s404_s27 }
  0x52   : > { %s394_s28 = scalar_lea.sflag [#allocation6], %s393_s14  ;;  %s2390_s23 = scalar_lea.vmem %s405_s27, 128 }
  0x53   : > { %p2379_p10 = pneg %p2717_p9  ;;  %p2391_p12 = scmp.ne.s32.totalorder %s405_s27, %s2390_s23 }
  0x54   : > { %s2501_s21 = smov [#allocation5]  }
  0x55   : > { %p2393_p6 = pnand %p2391_p12, %p2379_p10  ;;  %s2395_s12 = sshll.u32 %s2501_s21, 4  ;;  %s2396_s12 = int_to_ptr.vmem [resolvable:$false] %s2395_s12 }
  0x56   : > { %s2397_s3 = scalar_lea.vmem %s2396_s12, 256  ;;  %p2398_p4 = scmp.lt.s32.totalorder %s405_s27, %s2396_s12 }
  0x57   : > { %p2394_p13 = pneg %p2393_p6  ;;  %p2399_p5 = scmp.lt.s32.totalorder %s2397_s3, %s2390_s23 }
  0x59   : > { %p2400_p8 = por %p2399_p5, %p2398_p4 }
  0x5b   : > { %p2401_p11 = pnand %p2400_p8, %p2394_p13 }
  0x5d   : > { %2404 = shalt.err (!%p2401_p11)
}
  0x5e   : > { %2169 = dma.hbm_to_vmem [thread:$0]  (!%p2717_p9), %s402_s7, 128, %s405_s27, %s394_s28  }
  0x5f   : > { %413 = sbr.rel (%p2615_p3) target bundleno = 2381 (0x94d), region = 64  ;;  %s2728_s5 = sand.u32 (!%p2615_p3), 1, %s2477_s18  }
  0x60   : > { %s1966_s9 = sshll.u32 (!%p2615_p3), %s2728_s5, 3  ;;  %s416_s21 = scalar_lea.sflag (!%p2615_p3), [#allocation6], %s2728_s5 }
  0x61   : > { %s419_s26 = scalar_lea.vmem (!%p2615_p3), [#allocation5], %s1966_s9 }
  0x64   : > { %2456 = dma.done.wait (%p2694_p0), %s416_s21, 128  }
  0x65   : > { %2458 = vsyncadd (%p2694_p0), %s416_s21, 4294967168 }
  0x66   : > { %2460 = dma.done.wait (%p2610_p1), [#allocation9], 1024  }
  0x67   : > { %2462 = vsyncadd (%p2610_p1), [#allocation9], 4294966272 }
  0x68   : > { %2464 = dma.done.wait (%p2610_p1), [#allocation12], 1024  }
  0x69   : > { %2466 = vsyncadd (%p2610_p1), [#allocation12], 4294966272  ;;  %vm481_vm0 = vcmask 261120   ;;  %v2746_v0 = vld [vmem:[%s419_s26] sm:$0xff]  ;;  %v2502_v8 = vmov 0.0   ;;  %vm2503_vm1 = vmmov 0  }
  0x6a   : > { %v482_v1 = vsel %vm481_vm0, %v2746_v0, 0.0  ;;  %v513_v7 = vld [vmem:[#allocation8 + $0x18] sm:$0xff]  ;;  %2040 = vmatprep.subr.mxu0 %v2502_v8  ;;  %v512_v9 = vld [vmem:[#allocation8 + $0x10] sm:$0xff]  ;;  %2048 = vmatprep.mubr.msk.f32.mxu0 %vm2503_vm1, %v2502_v8  ;;  %v511_v10 = vld [vmem:[#allocation8 + $0x8] sm:$0xff]  ;;  %vm594_vm2 = vcmask 64512   ;;  %s2504_s12 = smov 80  }
  0x6b   : > { %483 = vadd.xlane.f32.xlu0 %v482_v1  ;;  %2041 = vmatpush3.msra.mxu0 %v513_v7  ;;  %v510_v11 = vld [vmem:[#allocation8] sm:$0xff]  ;;  %v2765_v16 = vld [vmem:[%s2932_s1] ss:$0 sm:$0xff]  ;;  %s2505_s14 = smov 96   ;;  %s2506_s16 = smov 88  }
  0x6c   : > { %2051 = vmatprep.subr.mxu1 %v2502_v8  ;;  %2042 = vmatprep.subr.mxu0 %v2502_v8  ;;  %v2770_v18 = vld [vmem:[%s2933_s2] ss:$0 sm:$0xff]  ;;  %s2507_s15 = smov 120   ;;  %s2508_s28 = smov 72  }
  0x6d   : > { %2053 = vmatprep.mubr.msk.f32.mxu1 %vm2503_vm1, %v2502_v8  ;;  %2043 = vmatpush3.msra.mxu0 %v512_v9  ;;  %v1972_v21 = vld [vmem:[%s2935_s4] ss:$0 sm:$0xff]  ;;  %s2509_s23 = smov 112   ;;  %s2510_s3 = smov 104  }
  0x6e   : > { %2044 = vmatprep.subr.mxu0 %v2502_v8  ;;  %s2511_s21 = smov 64   ;;  %s2512_s26 = smov 48  }
  0x6f   : > { %2045 = vmatpush3.msra.mxu0 %v511_v10  ;;  %s2513_s7 = smov 40   ;;  %s2514_s17 = smov 56  }
  0x70   : > { %2046 = vmatprep.subr.mxu0 %v2502_v8 }
  0x71   : > { %2047 = vmatpush3.msra.mxu0 %v510_v11 }
  0x72   : > { %2061 = vmatprep.subr.mxu0 %v2502_v8 }
  0xf4   : > { %v484_v2 = vpop.xlane.xlu0 %483 }
  0xf5   : > { %v486_v3 = vmul.f32 0.03125, %v484_v2 }
  0xf7   : > { %v487_v4 = vsub.f32 %v2746_v0, %v486_v3 }
  0xf9   : > { %v488_v5 = vmul.f32 %v487_v4, %v487_v4 }
  0xfb   : > { %v489_v6 = vsel %vm481_vm0, %v488_v5, 0.0 }
  0xfc   : > { %490 = vadd.xlane.f32.xlu0 %v489_v6 }
 0x185   : > { %v491_v12 = vpop.xlane.xlu0 %490 }
 0x186   : > { %v492_v13 = vmul.f32 0.03125, %v491_v12 }
 0x188   : > { %v493_v14 = vadd.f32 1e-05, %v492_v13 }
 0x18a   : > { %2251 = vrsqrt.f32 %v493_v14 }
 0x197   : > { %v2252_v15 = vpop.eup %2251 }
 0x198   : > { %v495_v17 = vmul.f32 %v2252_v15, %v487_v4 }
 0x19a   : > { %v502_v19 = vmul.f32 %v2765_v16, %v495_v17 }
 0x19c   : > { %v509_v20 = vadd.f32 %v2770_v18, %v502_v19 }
 0x19e   : > { %2049 = vmatmul.mubr.msk.f32.vlgmr.msra.gmra.mxu0 %vm481_vm0, %v509_v20 }
 0x19f   : > { %2063 = vmatprep.mubr.msk.f32.mxu0 %vm2503_vm1, %v2502_v8 }
 0x25e   : > { %v590_v22 = vpop.f32.mrf.mxu0 }
 0x25f   : > { %v2780_v23 = vadd.f32 %v1972_v21, %v590_v22 }
 0x260   : > { %v2050_v24 = vpop.f32.mrf.mxu0 }
 0x261   : > { %625 = vrot.lane.b32.xlu0 %v2780_v23, %s2504_s12  ;;  %597 = vrot.lane.b32.xlu1 %v2780_v23, %s2505_s14  ;;  %595 = vst.msk [vmem:[#allocation2] sm:$0xff] %vm594_vm2, %v2780_v23 }
 0x265   : > { %610 = vrot.lane.b32.xlu1 %v2780_v23, %s2506_s16  ;;  %s1996_s16 = sshll.u32 %s2485_s20, 7  ;;  %s2515_s20 = smov [#allocation14]  }
 0x268   : > { %v654_v31 = vld [vmem:[#allocation2] sm:$0xff] }
 0x269   : > { %605 = vrot.lane.b32.xlu1 %v2780_v23, %s2507_s15  ;;  %s473_s15 = scalar_lea.vmem [#allocation14], %s1966_s9 }
 0x26d   : > { %640 = vrot.lane.b32.xlu1 %v2780_v23, %s2508_s28  ;;  %s1834_s28 = sshll.u32 %s473_s15, 4  ;;  %s1835_s28 = int_to_ptr.vmem [resolvable:$true] %s1834_s28 }
 0x271   : > { %620 = vrot.lane.b32.xlu1 %v2780_v23, %s2509_s23 }
 0x275   : > { %635 = vrot.lane.b32.xlu1 %v2780_v23, %s2510_s3 }
 0x2d3   : > { %v626_v25 = vpop.permute.xlu0 %625  ;;  %v598_v26 = vpop.permute.xlu1 %597 }
 0x2d4   : > { %629 = vst.msk [vmem:[#allocation3 + $0x10] sm:$0xff] %vm594_vm2, %v626_v25  ;;  %600 = vst.msk [vmem:[#allocation3] sm:$0xff] %vm594_vm2, %v598_v26 }
 0x2d7   : > { %v611_v27 = vpop.permute.xlu1 %610 }
 0x2d8   : > { %614 = vst.msk [vmem:[#allocation3 + $0x8] sm:$0xff] %vm594_vm2, %v611_v27 }
 0x2db   : > { %v606_v28 = vpop.permute.xlu1 %605  ;;  %v658_v29 = vld [vmem:[#allocation3] sm:$0xff]  ;;  %v660_v30 = vld [vmem:[#allocation3 + $0x10] sm:$0xff] }
 0x2dc   : > { %609 = vst.msk [vmem:[#allocation2 + $0x8] sm:$0xff] %vm594_vm2, %v606_v28  ;;  %2052 = vmatpush3.xpose.msk.msra.mxu1 %vm594_vm2, %v658_v29  ;;  %2062 = vmatpush3.xpose.msk.msra.mxu0 %vm594_vm2, %v660_v30 }
 0x2dd   : > { %2056 = vmatprep.subr.mxu1 %v2502_v8  ;;  %2071 = vmatprep.subr.mxu0 %v2502_v8 }
 0x2df   : > { %v641_v32 = vpop.permute.xlu1 %640  ;;  %2054 = vmatmul.mubr.msk.f32.vlgmr.msra.gmra.mxu1 %vm594_vm2, %v654_v31  ;;  %v659_v33 = vld [vmem:[#allocation3 + $0x8] sm:$0xff] }
 0x2e0   : > { %644 = vst.msk [vmem:[#allocation3 + $0x18] sm:$0xff] %vm594_vm2, %v641_v32  ;;  %2057 = vmatpush3.xpose.msk.msra.mxu1 %vm594_vm2, %v659_v33  ;;  %2058 = vmatprep.mubr.msk.f32.mxu1 %vm2503_vm1, %v2502_v8  ;;  %v1307_v32 = vld [vmem:[#allocation10] sm:$0xff]  ;;  %v1308_v33 = vld [vmem:[#allocation10 + $0x8] sm:$0xff] }
 0x2e1   : > { %2066 = vmatprep.subr.mxu1 %v2502_v8 }
 0x2e3   : > { %v621_v34 = vpop.permute.xlu1 %620  ;;  %v655_v35 = vld [vmem:[#allocation2 + $0x8] sm:$0xff] }
 0x2e4   : > { %624 = vst.msk [vmem:[#allocation2 + $0x10] sm:$0xff] %vm594_vm2, %v621_v34  ;;  %2059 = vmatmul.mubr.msk.f32.vlgmr.msra.gmra.mxu1 %vm594_vm2, %v655_v35  ;;  %v1309_v34 = vld [vmem:[#allocation10 + $0x10] sm:$0xff] }
 0x2e5   : > { %2068 = vmatprep.mubr.msk.f32.mxu1 %vm2503_vm1, %v2502_v8 }
 0x2e7   : > { %v636_v36 = vpop.permute.xlu1 %635  ;;  %v661_v37 = vld [vmem:[#allocation3 + $0x18] sm:$0xff] }
 0x2e8   : > { %639 = vst.msk [vmem:[#allocation2 + $0x18] sm:$0xff] %vm594_vm2, %v636_v36  ;;  %2067 = vmatpush3.xpose.msk.msra.mxu1 %vm594_vm2, %v661_v37 }
 0x2e9   : > { %2076 = vmatprep.subr.mxu1 %v2502_v8 }
 0x2eb   : > { %v656_v38 = vld [vmem:[#allocation2 + $0x10] sm:$0xff] }
 0x2ec   : > { %2064 = vmatmul.mubr.msk.f32.vlgmr.msra.gmra.mxu0 %vm594_vm2, %v656_v38  ;;  %v1310_v38 = vld [vmem:[#allocation10 + $0x18] sm:$0xff] }
 0x2ed   : > { %2073 = vmatprep.mubr.msk.f32.mxu0 %vm2503_vm1, %v2502_v8 }
 0x2ef   : > { %v657_v39 = vld [vmem:[#allocation2 + $0x18] sm:$0xff] }
 0x2f0   : > { %2069 = vmatmul.mubr.msk.f32.vlgmr.msra.gmra.mxu1 %vm594_vm2, %v657_v39 }
 0x2f1   : > { %2078 = vmatprep.mubr.msk.f32.mxu1 %vm2503_vm1, %v2502_v8 }
 0x39f   : > { %v735_v40 = vpop.f32.mrf.mxu1 }
 0x3a0   : > { %v967_v41 = vsel %vm594_vm2, %v735_v40, -inf }
 0x3a1   : > { %968 = vmax.xlane.f32.xlu1 %v967_v41  ;;  %v2055_v42 = vpop.f32.mrf.mxu1 }
 0x3a4   : > { %v811_v43 = vpop.f32.mrf.mxu1 }
 0x3a5   : > { %v970_v44 = vsel %vm594_vm2, %v811_v43, -inf }
 0x3a6   : > { %971 = vmax.xlane.f32.xlu0 %v970_v44  ;;  %v2060_v45 = vpop.f32.mrf.mxu1 }
 0x3ac   : > { %v887_v46 = vpop.f32.mrf.mxu0 }
 0x3ad   : > { %v973_v47 = vsel %vm594_vm2, %v887_v46, -inf }
 0x3ae   : > { %974 = vmax.xlane.f32.xlu1 %v973_v47  ;;  %v2065_v48 = vpop.f32.mrf.mxu0 }
 0x3b0   : > { %v963_v49 = vpop.f32.mrf.mxu1 }
 0x3b1   : > { %v976_v50 = vsel %vm594_vm2, %v963_v49, -inf }
 0x3b2   : > { %977 = vmax.xlane.f32.xlu0 %v976_v50  ;;  %v2070_v51 = vpop.f32.mrf.mxu1 }
 0x3bf   : > { %601 = vrot.lane.b32.xlu1 %v2780_v23, %s2511_s21  ;;  %s1832_s21 = scalar_lea.hbm %s2942_s11, %s1996_s16 }
 0x42a   : > { %v969_v52 = vpop.xlane.xlu1 %968 }
 0x42b   : > { %v979_v53 = vsub.f32 %v735_v40, %v969_v52 }
 0x42d   : > { %v983_v54 = vmul.f32 1.442695, %v979_v53 }
 0x42f   : > { %2253 = vpow2.f32 %v983_v54  ;;  %v972_v55 = vpop.xlane.xlu0 %971 }
 0x430   : > { %v980_v56 = vsub.f32 %v811_v43, %v972_v55 }
 0x432   : > { %v985_v57 = vmul.f32 1.442695, %v980_v56 }
 0x434   : > { %2255 = vpow2.f32 %v985_v57 }
 0x437   : > { %v975_v58 = vpop.xlane.xlu1 %974 }
 0x438   : > { %v981_v59 = vsub.f32 %v887_v46, %v975_v58  ;;  %v1990_v46 = vld [vmem:[%s2937_s6] ss:$0 sm:$0xff] }
 0x43a   : > { %v987_v60 = vmul.f32 1.442695, %v981_v59 }
 0x43b   : > { %v978_v61 = vpop.xlane.xlu0 %977  ;;  %v602_v62 = vpop.permute.xlu1 %601 }
 0x43c   : > { %v2254_v63 = vpop.eup %2253  ;;  %2257 = vpow2.f32 %v987_v60  ;;  %v982_v1 = vsub.f32 %v963_v49, %v978_v61  ;;  %604 = vst.msk [vmem:[#allocation4] sm:$0xff] %vm594_vm2, %v602_v62 }
 0x43d   : > { %v991_v2 = vsel %vm594_vm2, %v2254_v63, 0.0 }
 0x43e   : > { %v989_v3 = vmul.f32 1.442695, %v982_v1  ;;  %992 = vadd.xlane.f32.xlu1 %v991_v2  ;;  %v1647_v1 = vld [vmem:[#allocation11 + $0x18] sm:$0xff]  ;;  %v1646_v2 = vld [vmem:[#allocation11 + $0x10] sm:$0xff] }
 0x440   : > { %2259 = vpow2.f32 %v989_v3  ;;  %v1645_v3 = vld [vmem:[#allocation11 + $0x8] sm:$0xff] }
 0x441   : > { %v2256_v4 = vpop.eup %2255 }
 0x442   : > { %v994_v5 = vsel %vm594_vm2, %v2256_v4, 0.0 }
 0x443   : > { %995 = vadd.xlane.f32.xlu0 %v994_v5  ;;  %v1011_v6 = vld [vmem:[#allocation4] sm:$0xff] }
 0x444   : > { %2072 = vmatpush3.msra.mxu0 %v1011_v6 }
 0x445   : > { %2081 = vmatprep.subr.mxu0 %v2502_v8 }
 0x449   : > { %v2258_v7 = vpop.eup %2257 }
 0x44a   : > { %v997_v9 = vsel %vm594_vm2, %v2258_v7, 0.0 }
 0x44b   : > { %998 = vadd.xlane.f32.xlu1 %v997_v9 }
 0x44d   : > { %v2260_v10 = vpop.eup %2259 }
 0x44e   : > { %v1000_v11 = vsel %vm594_vm2, %v2260_v10, 0.0 }
 0x44f   : > { %1001 = vadd.xlane.f32.xlu0 %v1000_v11 }
 0x45c   : > { %630 = vrot.lane.b32.xlu1 %v2780_v23, %s2512_s26  ;;  %s1820_s26 = scalar_lea.sflag [#allocation7], %s2728_s5 }
 0x460   : > { %645 = vrot.lane.b32.xlu1 %v2780_v23, %s2513_s7  ;;  %s2405_s7 = scalar_lea.vmem %s1835_s28, 128 }
 0x461   : > { %p2406_p1 = scmp.ne.s32.totalorder %s1835_s28, %s2405_s7 }
 0x463   : > { %p2407_p3 = pnand %p2406_p1, %p2698_p2 }
 0x465   : > { %615 = vrot.lane.b32.xlu0 %v2780_v23, %s2514_s17  ;;  %p2408_p5 = pneg %p2407_p3  ;;  %s2409_s17 = sshll.u32 %s2515_s20, 4  ;;  %s2410_s17 = int_to_ptr.vmem [resolvable:$false] %s2409_s17 }
 0x466   : > { %s2411_s9 = scalar_lea.vmem %s2410_s17, 256  ;;  %p2412_p0 = scmp.lt.s32.totalorder %s1835_s28, %s2410_s17 }
 0x467   : > { %p2413_p8 = scmp.lt.s32.totalorder %s2411_s9, %s2405_s7 }
 0x469   : > { %p2414_p7 = por %p2413_p8, %p2412_p0 }
 0x46b   : > { %p2415_p9 = pnand %p2414_p7, %p2408_p5 }
 0x4c7   : > { %v993_v12 = vpop.xlane.xlu1 %992 }
 0x4c8   : > { %2261 = vrcp.f32 %v993_v12  ;;  %v1736_v12 = vld [vmem:[#allocation13 + $0x18] sm:$0xff] }
 0x4cc   : > { %v996_v13 = vpop.xlane.xlu0 %995 }
 0x4cd   : > { %2263 = vrcp.f32 %v996_v13  ;;  %v1735_v13 = vld [vmem:[#allocation13 + $0x10] sm:$0xff] }
 0x4d4   : > { %v999_v14 = vpop.xlane.xlu1 %998 }
 0x4d5   : > { %v2262_v15 = vpop.eup %2261  ;;  %2265 = vrcp.f32 %v999_v14  ;;  %v1734_v14 = vld [vmem:[#allocation13 + $0x8] sm:$0xff] }
 0x4d6   : > { %v1007_v17 = vmul.f32 %v2262_v15, %v2254_v63  ;;  %v1733_v15 = vld [vmem:[#allocation13] sm:$0xff] }
 0x4d8   : > { %v1002_v19 = vpop.xlane.xlu0 %1001  ;;  %2074 = vmatmul.mubr.msk.f32.vlgmr.msra.gmra.mxu0 %vm594_vm2, %v1007_v17  ;;  %v631_v20 = vpop.permute.xlu1 %630 }
 0x4d9   : > { %2267 = vrcp.f32 %v1002_v19  ;;  %634 = vst.msk [vmem:[#allocation4 + $0x10] sm:$0xff] %vm594_vm2, %v631_v20  ;;  %2083 = vmatprep.mubr.msk.f32.mxu0 %vm2503_vm1, %v2502_v8 }
 0x4da   : > { %v2264_v24 = vpop.eup %2263 }
 0x4db   : > { %v1008_v28 = vmul.f32 %v2264_v24, %v2256_v4 }
 0x4dc   : > { %v616_v21 = vpop.permute.xlu0 %615  ;;  %v646_v22 = vpop.permute.xlu1 %645 }
 0x4dd   : > { %619 = vst.msk [vmem:[#allocation4 + $0x8] sm:$0xff] %vm594_vm2, %v616_v21  ;;  %649 = vst.msk [vmem:[#allocation4 + $0x18] sm:$0xff] %vm594_vm2, %v646_v22 }
 0x4e0   : > { %v1013_v23 = vld [vmem:[#allocation4 + $0x10] sm:$0xff] }
 0x4e1   : > { %2082 = vmatpush3.msra.mxu0 %v1013_v23 }
 0x4e2   : > { %v2266_v25 = vpop.eup %2265  ;;  %2091 = vmatprep.subr.mxu0 %v2502_v8 }
 0x4e3   : > { %v1009_v26 = vmul.f32 %v2266_v25, %v2258_v7 }
 0x4e4   : > { %v1012_v27 = vld [vmem:[#allocation4 + $0x8] sm:$0xff]  ;;  %v1014_v30 = vld [vmem:[#allocation4 + $0x18] sm:$0xff] }
 0x4e5   : > { %2077 = vmatpush3.msra.mxu1 %v1012_v27  ;;  %2084 = vmatmul.mubr.msk.f32.vlgmr.msra.gmra.mxu0 %vm594_vm2, %v1009_v26 }
 0x4e6   : > { %v2268_v29 = vpop.eup %2267  ;;  %2079 = vmatmul.mubr.msk.f32.vlgmr.msra.gmra.mxu1 %vm594_vm2, %v1008_v28  ;;  %2086 = vmatprep.subr.mxu1 %v2502_v8 }
 0x4e7   : > { %2087 = vmatpush3.msra.mxu1 %v1014_v30  ;;  %2088 = vmatprep.mubr.msk.f32.mxu1 %vm2503_vm1, %v2502_v8  ;;  %v1010_v31 = vmul.f32 %v2268_v29, %v2260_v10 }
 0x4e8   : > { %2093 = vmatprep.mubr.msk.f32.mxu0 %vm2503_vm1, %v2502_v8  ;;  %2096 = vmatprep.subr.mxu1 %v2502_v8 }
 0x4e9   : > { %2092 = vmatpush3.msra.mxu0 %v1307_v32 }
 0x4ea   : > { %2089 = vmatmul.mubr.msk.f32.vlgmr.msra.gmra.mxu1 %vm594_vm2, %v1010_v31  ;;  %2101 = vmatprep.subr.mxu0 %v2502_v8 }
 0x4eb   : > { %2098 = vmatprep.mubr.msk.f32.mxu1 %vm2503_vm1, %v2502_v8  ;;  %2097 = vmatpush3.msra.mxu1 %v1308_v33 }
 0x4ec   : > { %2106 = vmatprep.subr.mxu1 %v2502_v8 }
 0x598   : > { %v1084_v35 = vpop.f32.mrf.mxu0 }
 0x599   : > { %2094 = vmatmul.mubr.msk.f32.vlgmr.msra.gmra.mxu0 %vm594_vm2, %v1084_v35 }
 0x59a   : > { %v2075_v36 = vpop.f32.mrf.mxu0  ;;  %2102 = vmatpush3.msra.mxu0 %v1309_v34  ;;  %2103 = vmatprep.mubr.msk.f32.mxu0 %vm2503_vm1, %v2502_v8 }
 0x59b   : > { %2111 = vmatprep.subr.mxu0 %v2502_v8 }
 0x5a5   : > { %v1230_v37 = vpop.f32.mrf.mxu0 }
 0x5a6   : > { %v1157_v39 = vpop.f32.mrf.mxu1  ;;  %2104 = vmatmul.mubr.msk.f32.vlgmr.msra.gmra.mxu0 %vm594_vm2, %v1230_v37 }
 0x5a7   : > { %v2085_v40 = vpop.f32.mrf.mxu0  ;;  %2099 = vmatmul.mubr.msk.f32.vlgmr.msra.gmra.mxu1 %vm594_vm2, %v1157_v39  ;;  %2119 = vmatprep.mubr.msk.f32.mxu0 %vm2503_vm1, %v2502_v8 }
 0x5a8   : > { %v2080_v41 = vpop.f32.mrf.mxu1  ;;  %2107 = vmatpush3.msra.mxu1 %v1310_v38  ;;  %2108 = vmatprep.mubr.msk.f32.mxu1 %vm2503_vm1, %v2502_v8 }
 0x5a9   : > { %2122 = vmatprep.subr.mxu1 %v2502_v8  ;;  %2112 = vmatpush3.msra.mxu0 %v1647_v1 }
 0x5aa   : > { %v1303_v42 = vpop.f32.mrf.mxu1  ;;  %2113 = vmatprep.subr.mxu0 %v2502_v8 }
 0x5ab   : > { %2109 = vmatmul.mubr.msk.f32.vlgmr.msra.gmra.mxu1 %vm594_vm2, %v1303_v42  ;;  %2114 = vmatpush3.msra.mxu0 %v1646_v2 }
 0x5ac   : > { %v2090_v43 = vpop.f32.mrf.mxu1  ;;  %2130 = vmatprep.mubr.msk.f32.mxu1 %vm2503_vm1, %v2502_v8  ;;  %2115 = vmatprep.subr.mxu0 %v2502_v8 }
 0x5ad   : > { %2116 = vmatpush3.msra.mxu0 %v1645_v3  ;;  %2123 = vmatpush3.msra.mxu1 %v1736_v12 }
 0x5ae   : > { %2117 = vmatprep.subr.mxu0 %v2502_v8  ;;  %2124 = vmatprep.subr.mxu1 %v2502_v8 }
 0x5af   : > { %2125 = vmatpush3.msra.mxu1 %v1735_v13 }
 0x5b0   : > { %2126 = vmatprep.subr.mxu1 %v2502_v8 }
 0x5b1   : > { %2127 = vmatpush3.msra.mxu1 %v1734_v14 }
 0x5b2   : > { %2128 = vmatprep.subr.mxu1 %v2502_v8  ;;  %v1993_v8 = vld [vmem:[%s2941_s10] ss:$0 sm:$0xff] }
 0x5b3   : > { %2129 = vmatpush3.msra.mxu1 %v1733_v15 }
 0x659   : > { %v1380_v44 = vpop.f32.mrf.mxu0 }
 0x65a   : > { %v1610_v47 = vadd.f32 %v1990_v46, %v1380_v44 }
 0x65b   : > { %v2095_v45 = vpop.f32.mrf.mxu0 }
 0x666   : > { %v1526_v48 = vpop.f32.mrf.mxu0 }
 0x667   : > { %v1453_v49 = vpop.f32.mrf.mxu1 }
 0x668   : > { %v1611_v50 = vadd.f32 %v1610_v47, %v1453_v49  ;;  %v2105_v51 = vpop.f32.mrf.mxu0 }
 0x669   : > { %v2100_v52 = vpop.f32.mrf.mxu1 }
 0x66a   : > { %v1612_v53 = vadd.f32 %v1611_v50, %v1526_v48 }
 0x66b   : > { %v1599_v54 = vpop.f32.mrf.mxu1 }
 0x66c   : > { %v1613_v55 = vadd.f32 %v1612_v53, %v1599_v54 }
 0x66d   : > { %v2110_v56 = vpop.f32.mrf.mxu1 }
 0x66e   : > { %v1614_v57 = vadd.f32 %v1613_v55, %v2746_v0  ;;  %v1644_v0 = vld [vmem:[#allocation11] sm:$0xff] }
 0x66f   : > { %2118 = vmatpush3.msra.mxu0 %v1644_v0 }
 0x670   : > { %v1616_v58 = vsel %vm481_vm0, %v1614_v57, 0.0 }
 0x671   : > { %1617 = vadd.xlane.f32.xlu0 %v1616_v58 }
 0x6fa   : > { %v1618_v59 = vpop.xlane.xlu0 %1617 }
 0x6fb   : > { %v1620_v60 = vmul.f32 0.03125, %v1618_v59 }
 0x6fd   : > { %v1621_v61 = vsub.f32 %v1614_v57, %v1620_v60 }
 0x6ff   : > { %v1622_v62 = vmul.f32 %v1621_v61, %v1621_v61 }
 0x701   : > { %v1623_v63 = vsel %vm481_vm0, %v1622_v62, 0.0 }
 0x702   : > { %1624 = vadd.xlane.f32.xlu1 %v1623_v63 }
 0x78b   : > { %v1625_v4 = vpop.xlane.xlu1 %1624 }
 0x78c   : > { %v1626_v5 = vmul.f32 0.03125, %v1625_v4 }
 0x78e   : > { %v1627_v6 = vadd.f32 1e-05, %v1626_v5 }
 0x790   : > { %2269 = vrsqrt.f32 %v1627_v6 }
 0x79d   : > { %v2270_v7 = vpop.eup %2269 }
 0x79e   : > { %v1629_v9 = vmul.f32 %v2270_v7, %v1621_v61 }
 0x7a0   : > { %v1636_v10 = vmul.f32 %v2765_v16, %v1629_v9  ;;  %v1991_v16 = vld [vmem:[%s2939_s8] ss:$0 sm:$0xff] }
 0x7a2   : > { %v1643_v11 = vadd.f32 %v2770_v18, %v1636_v10 }
 0x7a4   : > { %2120 = vmatmul.mubr.msk.f32.vlgmr.msra.gmra.mxu0 %vm481_vm0, %v1643_v11 }
 0x864   : > { %v1724_v18 = vpop.f32.mrf.mxu0 }
 0x865   : > { %v1725_v17 = vadd.f32 %v1991_v16, %v1724_v18 }
 0x866   : > { %v2121_v19 = vpop.f32.mrf.mxu0 }
 0x867   : > { %v1729_v20 = vmul.f32 0.70710677, %v1725_v17  ;;  %v1728_v22 = vmul.f32 0.5, %v1725_v17 }
 0x869   : > { %2271 = verf.f32 %v1729_v20 }
 0x876   : > { %v2272_v21 = vpop.eup %2271 }
 0x877   : > { %v1731_v23 = vadd.f32 1.0, %v2272_v21 }
 0x879   : > { %v1732_v24 = vmul.f32 %v1731_v23, %v1728_v22 }
 0x87b   : > { %2131 = vmatmul.mubr.msk.f32.vlgmr.msra.gmra.mxu1 %vm481_vm0, %v1732_v24 }
 0x93b   : > { %v1813_v25 = vpop.f32.mrf.mxu1 }
 0x93c   : > { %v1814_v26 = vadd.f32 %v1993_v8, %v1813_v25 }
 0x93d   : > { %v2132_v27 = vpop.f32.mrf.mxu1 }
 0x93e   : > { %v1817_v28 = vadd.f32 %v1814_v26, %v1614_v57 }
 0x940   : > { %1818 = vst.msk [vmem:[%s473_s15] sm:$0xff] %vm481_vm0, %v1817_v28 }
 0x941   : > { %2418 = shalt.err (!%p2415_p9)
}
 0x942   : > { %s2419_s24 = scalar_lea.hbm %s1832_s21, 128  ;;  %s2423_s27 = scalar_lea.hbm %s2942_s11, 256 }
 0x943   : > { %p2420_p10 = scmp.ne.s32.totalorder %s1832_s21, %s2419_s24  ;;  %p2424_p13 = scmp.lt.s32.totalorder %s1832_s21, %s2942_s11 }
 0x944   : > { %p2425_p4 = scmp.lt.s32.totalorder %s2423_s27, %s2419_s24 }
 0x945   : > { %p2421_p12 = pnand %p2420_p10, %p2698_p2 }
 0x946   : > { %p2426_p11 = por %p2425_p4, %p2424_p13 }
 0x947   : > { %p2422_p6 = pneg %p2421_p12 }
 0x949   : > { %p2427_p1 = pnand %p2426_p11, %p2422_p6 }
 0x94b   : > { %2430 = shalt.err (!%p2427_p1)
}
 0x94c   : > { %2151 = dma.vmem_to_hbm [thread:$0]  (%p2698_p2), %s1835_s28, 128, %s1832_s21, %s1820_s26  }
 0x94d PF: > { %s2968_s14 = sld [smem:[#allocation19_spill]]  ;;  %p2969_p3 = scmp.ne.s32.totalorder %s2966_s13, 0 }
 0x94e   : > { %p2970_p5 = scmp.ge.s32.totalorder %s2493_s22, 2 }
 0x950   : > { %p2171_p0 = pnand %p2970_p5, %p2969_p3 }
 0x952   : > { %p2172_p8 = pneg %p2171_p0 }
 0x953   : > { %s1846_s16 = sand.u32 1, %s2968_s14  }
 0x954   : > { %s1847_s15 = scalar_lea.sflag [#allocation7], %s1846_s16 }
 0x955   : > { %2468 = dma.done.wait (%p2172_p8), %s1847_s15, 128  }
 0x956   : > { %2470 = vsyncadd (%p2172_p8), %s1847_s15, 4294967168  ;;  %s29_s22 = sadd.s32 1, %s2493_s22   ;;  %s2971_s23 = sld [smem:[#allocation22_spill]] }
 0x957   : > { %p26_p7 = scmp.ge.s32.totalorder %s29_s22, 4   ;;  %s2972_s20 = sld [smem:[#allocation20_spill]] }
 0x958   : > { %s2973_s21 = sld [smem:[#allocation21_spill]]  ;;  %s2974_s17 = smov %s2477_s18 }
 0x959   : > { %s2975_s18 = smov %s2481_s19  ;;  %28 = sbr.rel (!%p26_p7) target bundleno = 13 (0xd), region = 140 }
 0x95c   : > { %s2976_s19 = smov %s2971_s23 }
 0x95e   :  { %1852 = vsyncpa [#allocation6], 1 }
 0x95f   :  { %1854 = vsyncpa [#allocation6 + $0x1], 1 }
 0x960   :  { %1855 = vsyncpa [#allocation9], 1 }
 0x961   :  { %1856 = vsyncpa [#allocation12], 1 }
 0x962   :  { %1857 = vsyncpa [#allocation7], 1 }
 0x963   :  { %1859 = vsyncpa [#allocation7 + $0x1], 1 }

</bundles_post_ra>
